<compile_context>
chip_gen: v5e
topology: v5e:2x2
jax: 0.10.0
libtpu: 0.0.40
codegen_flags: <defaults>
</compile_context>

<pallas_src>
import functools

import jax
import jax.numpy as jnp
from jax.experimental import pallas as pl
from jax.experimental.pallas import tpu as pltpu


# ---------------------------------------------------------------------------
# helpers
# ---------------------------------------------------------------------------
@functools.lru_cache(maxsize=None)
def _vmem_limit_bytes():
    """~80% of physical VMEM; 64 MiB-based fallback keeps v7x (64 MiB) safe."""
    try:
        cap = int(pltpu.get_tpu_info().vmem_capacity_bytes)
    except Exception:
        cap = 64 * 1024 * 1024
    return max(int(cap * 0.8), 32 * 1024 * 1024)


def _compiler_params(dim_sem):
    return pltpu.CompilerParams(dimension_semantics=dim_sem,
                                vmem_limit_bytes=_vmem_limit_bytes())


def _pick_tile(full, target):
    """`target` if it evenly tiles `full`, else fall back to the full extent.

    Real ViT-22B-scale dims are multiples of 128/256/512 so the target tiles
    apply; tiny demo dims fall back to the full extent, which satisfies the
    (8, 128) BlockSpec rule (block equals the full array dim)."""
    if full <= target:
        return full
    return target if full % target == 0 else full


# ---------------------------------------------------------------------------
# generic tiled matmul kernel:  out = act(x @ w + b)
# ---------------------------------------------------------------------------
def _matmul_kernel(x_ref, w_ref, b_ref, o_ref, acc_ref, *, activation):
    kk = pl.program_id(2)

    @pl.when(kk == 0)
    def _():
        acc_ref[...] = jnp.zeros_like(acc_ref)

    acc_ref[...] += jnp.dot(x_ref[...], w_ref[...],
                            preferred_element_type=jnp.float32)

    @pl.when(kk == pl.num_programs(2) - 1)
    def _():
        r = acc_ref[...] + b_ref[...].astype(jnp.float32)
        if activation == "gelu":          # exact erf GELU (torch nn.GELU default)
            r = 0.5 * r * (1.0 + jax.lax.erf(r * (2.0 ** -0.5)))
        elif activation == "tanh":
            r = jnp.tanh(r)
        o_ref[...] = r.astype(o_ref.dtype)


def pallas_matmul(x, w, b=None, *, activation=None,
                  compute_dtype=jnp.bfloat16, out_dtype=jnp.float32,
                  tm=256, tn=512, tk=512):
    M, K = x.shape
    K2, N = w.shape
    assert K == K2
    if b is None:
        b = jnp.zeros((1, N), jnp.float32)
    tm, tn, tk = _pick_tile(M, tm), _pick_tile(N, tn), _pick_tile(K, tk)

    kernel = functools.partial(_matmul_kernel, activation=activation)
    return pl.pallas_call(
        kernel,
        out_shape=jax.ShapeDtypeStruct((M, N), out_dtype),
        grid=(M // tm, N // tn, K // tk),
        in_specs=[
            pl.BlockSpec((tm, tk), lambda i, j, k: (i, k)),   # activations
            pl.BlockSpec((tk, tn), lambda i, j, k: (k, j)),   # weight tile stream
            pl.BlockSpec((1, tn), lambda i, j, k: (0, j)),    # bias
        ],
        out_specs=pl.BlockSpec((tm, tn), lambda i, j, k: (i, j)),
        scratch_shapes=[pltpu.VMEM((tm, tn), jnp.float32)],
        compiler_params=_compiler_params(("parallel", "parallel", "arbitrary")),
    )(x.astype(compute_dtype), w.astype(compute_dtype), b.astype(jnp.float32))


# ---------------------------------------------------------------------------
# fused LayerNorm(dim, no affine) + positional-embedding add
# ---------------------------------------------------------------------------
def _ln_pos_kernel(x_ref, pos_ref, o_ref, *, eps):
    x = x_ref[...].astype(jnp.float32)
    mu = jnp.mean(x, axis=-1, keepdims=True)
    var = jnp.mean((x - mu) ** 2, axis=-1, keepdims=True)
    y = (x - mu) * jax.lax.rsqrt(var + eps)
    o_ref[...] = (y + pos_ref[...].astype(jnp.float32)).astype(o_ref.dtype)


def ln_pos_add(x, pos, *, eps=1e-5, ts=256):
    B, N, D = x.shape
    ts = _pick_tile(N, ts)
    return pl.pallas_call(
        functools.partial(_ln_pos_kernel, eps=eps),
        out_shape=jax.ShapeDtypeStruct((B, N, D), x.dtype),
        grid=(B, N // ts),
        in_specs=[
            pl.BlockSpec((1, ts, D), lambda b, s: (b, s, 0)),
            pl.BlockSpec((1, ts, D), lambda b, s: (0, s, 0)),
        ],
        out_specs=pl.BlockSpec((1, ts, D), lambda b, s: (b, s, 0)),
        compiler_params=_compiler_params(("parallel", "parallel")),
    )(x, pos)


# ---------------------------------------------------------------------------
# flash-style attention with fused per-head LayerNorm on q/k
# ---------------------------------------------------------------------------
def _flash_attn_kernel(q_ref, k_ref, v_ref, o_ref, m_sc, l_sc, acc_sc,
                       *, scale, eps, compute_dtype, approx):
    ki = pl.program_id(2)

    @pl.when(ki == 0)
    def _():
        m_sc[...] = jnp.full(m_sc.shape, -jnp.inf, dtype=m_sc.dtype)
        l_sc[...] = jnp.zeros_like(l_sc)
        acc_sc[...] = jnp.zeros_like(acc_sc)

    def ln(t):                                      # per-head LN, no affine
        mu = jnp.mean(t, axis=-1, keepdims=True)
        var = jnp.mean((t - mu) ** 2, axis=-1, keepdims=True)
        return (t - mu) * jax.lax.rsqrt(var + eps)

    # scale folded into q (n*d multiplies instead of n^2 on the score matrix)
    q = (ln(q_ref[0].astype(jnp.float32)) * scale).astype(compute_dtype)
    k = ln(k_ref[0].astype(jnp.float32)).astype(compute_dtype)

    # QK^T by contracting the last dim of both operands — no explicit transpose.
    s = jax.lax.dot_general(q, k, (((1,), (1,)), ((), ())),
                            preferred_element_type=jnp.float32)    # (tq, tkv)

    m_prev = m_sc[...]
    m_new = jnp.maximum(m_prev, jnp.max(s, axis=-1, keepdims=True))
    alpha = jnp.exp(m_prev - m_new)
    p = jnp.exp(s - m_new)
    l_sc[...] = alpha * l_sc[...] + jnp.sum(p, axis=-1, keepdims=True)
    acc_sc[...] = alpha * acc_sc[...] + jnp.dot(
        p.astype(compute_dtype), v_ref[0].astype(compute_dtype),
        preferred_element_type=jnp.float32)
    m_sc[...] = m_new

    @pl.when(ki == pl.num_programs(2) - 1)
    def _():
        inv_l = pl.reciprocal(l_sc[...], approx=approx)   # EUP, not VALU divide
        o_ref[0] = (acc_sc[...] * inv_l).astype(o_ref.dtype)


def flash_attention(q, k, v, *, scale, eps=1e-5,
                    compute_dtype=jnp.bfloat16, approx=True, tq=128, tkv=128):
    """q, k, v: (batch*heads, seq, head_dim); LayerNorm on q/k fused inside."""
    BH, N, d = q.shape
    tq, tkv = _pick_tile(N, tq), _pick_tile(N, tkv)
    kernel = functools.partial(_flash_attn_kernel, scale=scale, eps=eps,
                               compute_dtype=compute_dtype, approx=approx)
    # TODO(synk): pack 2 heads per QK^T/PV contraction (2*d >= 256) to fill the
    # 256-wide MXU on v6e/v7x when head_dim == 128.
    return pl.pallas_call(
        kernel,
        out_shape=jax.ShapeDtypeStruct((BH, N, d), q.dtype),
        grid=(BH, N // tq, N // tkv),
        in_specs=[
            pl.BlockSpec((1, tq, d), lambda b, qi, ki: (b, qi, 0)),
            pl.BlockSpec((1, tkv, d), lambda b, qi, ki: (b, ki, 0)),
            pl.BlockSpec((1, tkv, d), lambda b, qi, ki: (b, ki, 0)),
        ],
        out_specs=pl.BlockSpec((1, tq, d), lambda b, qi, ki: (b, qi, 0)),
        scratch_shapes=[
            pltpu.VMEM((tq, 1), jnp.float32),   # running max
            pltpu.VMEM((tq, 1), jnp.float32),   # running denom
            pltpu.VMEM((tq, d), jnp.float32),   # output accumulator
        ],
        compiler_params=_compiler_params(("parallel", "parallel", "arbitrary")),
    )(q, k, v)


# ---------------------------------------------------------------------------
# model wrappers
# ---------------------------------------------------------------------------
def transformer_layer(x, p, heads, *, compute_dtype, approx):
    B, N, dim = x.shape
    d = dim // heads
    x2 = x.reshape(B * N, dim)

    qkv = pallas_matmul(x2, p["wqkv"], None, compute_dtype=compute_dtype)
    qkv = qkv.reshape(B, N, 3, heads, d)           # head split: layout plumbing
    q = qkv[:, :, 0].transpose(0, 2, 1, 3).reshape(B * heads, N, d)
    k = qkv[:, :, 1].transpose(0, 2, 1, 3).reshape(B * heads, N, d)
    v = qkv[:, :, 2].transpose(0, 2, 1, 3).reshape(B * heads, N, d)

    av = flash_attention(q, k, v, scale=dim ** (-0.5),
                         compute_dtype=compute_dtype, approx=approx)
    av = av.reshape(B, heads, N, d).transpose(0, 2, 1, 3).reshape(B * N, dim)

    attn_out = pallas_matmul(av, p["wout"], p["bout"], compute_dtype=compute_dtype)
    h1 = pallas_matmul(x2, p["w1"], p["b1"], activation="gelu",
                       compute_dtype=compute_dtype)
    par = pallas_matmul(h1, p["w2"], p["b2"], compute_dtype=compute_dtype)

    return (attn_out + par + x2).reshape(B, N, dim)   # ParallelAttentionFeed + Residual


def vit22bgan_forward(img, params, *, patch_size, heads,
                      compute_dtype=jnp.bfloat16, approx=True):
    B, C, H, W = img.shape
    p = patch_size
    hp, wp = H // p, W // p
    n_patch = hp * wp
    patch_dim = C * p * p
    dim = params["patch_w"].shape[1]

    # 'b c (h p1) (w p2) -> b (h w) (p1 p2 c)'
    x = img.reshape(B, C, hp, p, wp, p).transpose(0, 2, 4, 3, 5, 1)
    x = x.reshape(B * n_patch, patch_dim)

    x = pallas_matmul(x, params["patch_w"], params["patch_b"],
                      compute_dtype=compute_dtype)                  # patch_to_embedding
    x = ln_pos_add(x.reshape(B, n_patch, dim), params["pos"])       # LN + pos emb

    # TODO(synk): fuse depth into one pallas_call (or cross-call DMA futures) so
    # layer L+1 weights prefetch while layer L computes.
    for lp in params["layers"]:
        x = transformer_layer(x, lp, heads,
                              compute_dtype=compute_dtype, approx=approx)

    x = x.reshape(B * n_patch, dim)
    h = pallas_matmul(x, params["dec_w1"], params["dec_b1"], activation="gelu",
                      compute_dtype=compute_dtype)
    y = pallas_matmul(h, params["dec_w2"], params["dec_b2"], activation="tanh",
                      compute_dtype=compute_dtype)                  # tanh fused here

    # 'b (h w) (p1 p2 c) -> b c (h p1) (w p2)'
    y = y.reshape(B, hp, wp, p, p, C).transpose(0, 5, 1, 3, 2, 4)
    return y.reshape(B, C, H, W)


# ---------------------------------------------------------------------------
# parameter init (matches torch nn.Linear default uniform +- 1/sqrt(fan_in))
# ---------------------------------------------------------------------------
def _lin(k, fan_in, shape):
    bound = fan_in ** -0.5
    return jax.random.uniform(k, shape, jnp.float32, -bound, bound)


def init_layer_params(key, dim, mlp_dim):
    ks = jax.random.split(key, 7)
    return {
        "wqkv": _lin(ks[0], dim, (dim, 3 * dim)),
        "wout": _lin(ks[1], dim, (dim, dim)),
        "bout": _lin(ks[2], dim, (1, dim)),
        "w1":   _lin(ks[3], dim, (dim, mlp_dim)),
        "b1":   _lin(ks[4], dim, (1, mlp_dim)),
        "w2":   _lin(ks[5], mlp_dim, (mlp_dim, dim)),
        "b2":   _lin(ks[6], mlp_dim, (1, dim)),
    }


def init_params(key, *, image_size, patch_size, channels, dim, depth, heads, mlp_dim):
    num_patches = (image_size // patch_size) ** 2
    patch_dim = channels * patch_size ** 2
    ks = jax.random.split(key, 7 + depth)
    return {
        "pos":     jax.random.normal(ks[0], (1, num_patches, dim), jnp.float32),
        "patch_w": _lin(ks[1], patch_dim, (patch_dim, dim)),
        "patch_b": _lin(ks[2], patch_dim, (1, dim)),
        "dec_w1":  _lin(ks[3], dim, (dim, mlp_dim)),
        "dec_b1":  _lin(ks[4], dim, (1, mlp_dim)),
        "dec_w2":  _lin(ks[5], mlp_dim, (mlp_dim, patch_dim)),
        "dec_b2":  _lin(ks[6], mlp_dim, (1, patch_dim)),
        "layers":  [init_layer_params(k, dim, mlp_dim) for k in ks[7:]],
    }


# ---------------------------------------------------------------------------
# pure-JAX reference (f32) for the sanity check
# ---------------------------------------------------------------------------
def _ref_gelu(x):
    return 0.5 * x * (1.0 + jax.lax.erf(x * (2.0 ** -0.5)))


def _ref_ln(x, eps=1e-5):
    mu = x.mean(-1, keepdims=True)
    var = ((x - mu) ** 2).mean(-1, keepdims=True)
    return (x - mu) / jnp.sqrt(var + eps)


def _ref_layer(x, p, heads):
    b, n, dim = x.shape
    d = dim // heads
    qkv = (x @ p["wqkv"]).reshape(b, n, 3, heads, d)
    q = _ref_ln(qkv[:, :, 0].transpose(0, 2, 1, 3))
    k = _ref_ln(qkv[:, :, 1].transpose(0, 2, 1, 3))
    v = qkv[:, :, 2].transpose(0, 2, 1, 3)
    dots = jnp.einsum("bhid,bhjd->bhij", q, k) * dim ** (-0.5)
    attn = jax.nn.softmax(dots, axis=-1)
    av = jnp.einsum("bhij,bhjd->bhid", attn, v).transpose(0, 2, 1, 3).reshape(b, n, dim)
    attn_out = av @ p["wout"] + p["bout"]
    par = _ref_gelu(x @ p["w1"] + p["b1"]) @ p["w2"] + p["b2"]
    return attn_out + par + x


def _ref_forward(img, params, *, patch_size, heads):
    B, C, H, W = img.shape
    p = patch_size
    hp, wp = H // p, W // p
    x = img.reshape(B, C, hp, p, wp, p).transpose(0, 2, 4, 3, 5, 1)
    x = x.reshape(B, hp * wp, C * p * p)
    x = x @ params["patch_w"] + params["patch_b"]
    x = _ref_ln(x) + params["pos"]
    for lp in params["layers"]:
        x = _ref_layer(x, lp, heads)
    h = _ref_gelu(x @ params["dec_w1"] + params["dec_b1"])
    y = h @ params["dec_w2"] + params["dec_b2"]
    y = y.reshape(B, hp, wp, p, p, C).transpose(0, 5, 1, 3, 2, 4).reshape(B, C, H, W)
    return jnp.tanh(y)


# ---------------------------------------------------------------------------
if __name__ == "__main__":
    IMAGE, PATCH, CH = 16, 4, 4
    DIM, DEPTH, HEADS, MLP_DIM = 32, 2, 4, 64

    key = jax.random.PRNGKey(0)
    k_img, k_par = jax.random.split(key)
    img = jax.random.normal(k_img, (2, CH, IMAGE, IMAGE), jnp.float32)
    params = init_params(k_par, image_size=IMAGE, patch_size=PATCH, channels=CH,
                         dim=DIM, depth=DEPTH, heads=HEADS, mlp_dim=MLP_DIM)

    ref = _ref_forward(img, params, patch_size=PATCH, heads=HEADS)

    # exact-precision path (f32 MXU inputs, exact reciprocal) -> tight check
    fwd_f32 = jax.jit(functools.partial(
        vit22bgan_forward, patch_size=PATCH, heads=HEADS,
        compute_dtype=jnp.float32, approx=False))
    out_f32 = jax.block_until_ready(fwd_f32(img, params))
    assert out_f32.shape == img.shape
    assert jnp.allclose(out_f32, ref, rtol=1e-3, atol=1e-3), "f32 mismatch vs reference"

    # production path (bf16 MXU inputs, approx reciprocal) -> loose check
    fwd_bf16 = jax.jit(functools.partial(
        vit22bgan_forward, patch_size=PATCH, heads=HEADS,
        compute_dtype=jnp.bfloat16, approx=True))
    out_bf16 = jax.block_until_ready(fwd_bf16(img, params))
    assert out_bf16.shape == img.shape
    assert jnp.allclose(out_bf16, ref, rtol=5e-2, atol=5e-2), "bf16 mismatch vs reference"

    print("KERNEL_OK")
</pallas_src>

<mosaic_0001>
module attributes {stable_mosaic.version = 11 : i64} {
  func.func @_matmul_kernel(%arg0: i32, %arg1: i32, %arg2: i32, %arg3: memref<32x64xf32, #tpu.memory_space<vmem>>, %arg4: memref<64x32xf32, #tpu.memory_space<vmem>>, %arg5: memref<1x32xf32, #tpu.memory_space<vmem>>, %arg6: memref<32x32xf32, #tpu.memory_space<vmem>>, %arg7: memref<32x32xf32, #tpu.memory_space<vmem>>) attributes {dimension_semantics = [#tpu.dimension_semantics<parallel>, #tpu.dimension_semantics<parallel>, #tpu.dimension_semantics<arbitrary>], iteration_bounds = array<i64: 1, 1, 1>, scalar_prefetch = 0 : i64, scratch_operands = 1 : i64, tpu.core_type = #tpu.core_type<tc>, window_params = [{transform_indices = @transform_0, window_bounds = array<i64: 32, 64>}, {transform_indices = @transform_1, window_bounds = array<i64: 64, 32>}, {transform_indices = @transform_2, window_bounds = array<i64: 1, 32>}, {transform_indices = @transform_3, window_bounds = array<i64: 32, 32>}]} {
    %c0_i32 = arith.constant 0 : i32
    %0 = arith.cmpi eq, %arg2, %c0_i32 : i32
    %1 = arith.extui %0 : i1 to i32
    %c0_i32_0 = arith.constant 0 : i32
    %2 = arith.cmpi ne, %1, %c0_i32_0 : i32
    scf.if %2 {
      %cst_10 = arith.constant 0.000000e+00 : f32
      %12 = vector.broadcast %cst_10 : f32 to vector<32x32xf32>
      %c0_11 = arith.constant 0 : index
      %c0_12 = arith.constant 0 : index
      %13 = vector.load %arg7[%c0_11, %c0_12] : memref<32x32xf32, #tpu.memory_space<vmem>>, vector<32x32xf32>
      tpu.vector_store %arg7[%c0_11, %c0_12], %12 {strides = array<i32>} : memref<32x32xf32, #tpu.memory_space<vmem>>, vector<32x32xf32>,
    } else {
    }
    %c0 = arith.constant 0 : index
    %c0_1 = arith.constant 0 : index
    %3 = vector.load %arg7[%c0, %c0_1] : memref<32x32xf32, #tpu.memory_space<vmem>>, vector<32x32xf32>
    %c0_2 = arith.constant 0 : index
    %c0_3 = arith.constant 0 : index
    %4 = vector.load %arg3[%c0_2, %c0_3] : memref<32x64xf32, #tpu.memory_space<vmem>>, vector<32x64xf32>
    %c0_4 = arith.constant 0 : index
    %c0_5 = arith.constant 0 : index
    %5 = vector.load %arg4[%c0_4, %c0_5] : memref<64x32xf32, #tpu.memory_space<vmem>>, vector<64x32xf32>
    %cst = arith.constant dense<0.000000e+00> : vector<32x32xf32>
    %6 = tpu.matmul %4, %5, %cst {dimension_numbers = #tpu.dot_dimension_numbers<[1], [0], [0], [1], [0, 0, 1, 1], [], []>} : vector<32x64xf32>, vector<64x32xf32>, vector<32x32xf32> -> vector<32x32xf32>
    %7 = arith.addf %3, %6 : vector<32x32xf32>
    %c0_6 = arith.constant 0 : index
    %c0_7 = arith.constant 0 : index
    %8 = vector.load %arg7[%c0_6, %c0_7] : memref<32x32xf32, #tpu.memory_space<vmem>>, vector<32x32xf32>
    tpu.vector_store %arg7[%c0_6, %c0_7], %7 {strides = array<i32>} : memref<32x32xf32, #tpu.memory_space<vmem>>, vector<32x32xf32>,
    %c0_i32_8 = arith.constant 0 : i32
    %9 = arith.cmpi eq, %arg2, %c0_i32_8 : i32
    %10 = arith.extui %9 : i1 to i32
    %c0_i32_9 = arith.constant 0 : i32
    %11 = arith.cmpi ne, %10, %c0_i32_9 : i32
    scf.if %11 {
      %c0_10 = arith.constant 0 : index
      %c0_11 = arith.constant 0 : index
      %12 = vector.load %arg7[%c0_10, %c0_11] : memref<32x32xf32, #tpu.memory_space<vmem>>, vector<32x32xf32>
      %c0_12 = arith.constant 0 : index
      %c0_13 = arith.constant 0 : index
      %13 = vector.load %arg5[%c0_12, %c0_13] : memref<1x32xf32, #tpu.memory_space<vmem>>, vector<1x32xf32>
      %14 = vector.broadcast %13 : vector<1x32xf32> to vector<32x32xf32>
      %15 = arith.addf %12, %14 : vector<32x32xf32>
      %c0_14 = arith.constant 0 : index
      %c0_15 = arith.constant 0 : index
      %16 = vector.load %arg6[%c0_14, %c0_15] : memref<32x32xf32, #tpu.memory_space<vmem>>, vector<32x32xf32>
      tpu.vector_store %arg6[%c0_14, %c0_15], %15 {strides = array<i32>} : memref<32x32xf32, #tpu.memory_space<vmem>>, vector<32x32xf32>,
    } else {
    }
    return
  }
  func.func @transform_0(%arg0: i32, %arg1: i32, %arg2: i32) -> (i32, i32) {
    %c0_i32 = arith.constant 0 : i32
    return %arg0, %arg2 : i32, i32
  }
  func.func @transform_1(%arg0: i32, %arg1: i32, %arg2: i32) -> (i32, i32) {
    %c0_i32 = arith.constant 0 : i32
    return %arg2, %arg1 : i32, i32
  }
  func.func @transform_2(%arg0: i32, %arg1: i32, %arg2: i32) -> (i32, i32) {
    %c0_i32 = arith.constant 0 : i32
    %c0_i32_0 = arith.constant 0 : i32
    return %c0_i32, %arg1 : i32, i32
  }
  func.func @transform_3(%arg0: i32, %arg1: i32, %arg2: i32) -> (i32, i32) {
    %c0_i32 = arith.constant 0 : i32
    return %arg0, %arg1 : i32, i32
  }
}

module attributes {stable_mosaic.version = 11 : i64} {
  func.func @_ln_pos_kernel(%arg0: i32, %arg1: i32, %arg2: memref<1x16x32xf32, #tpu.memory_space<vmem>>, %arg3: memref<1x16x32xf32, #tpu.memory_space<vmem>>, %arg4: memref<1x16x32xf32, #tpu.memory_space<vmem>>) attributes {dimension_semantics = [#tpu.dimension_semantics<parallel>, #tpu.dimension_semantics<parallel>], iteration_bounds = array<i64: 2, 1>, scalar_prefetch = 0 : i64, scratch_operands = 0 : i64, tpu.core_type = #tpu.core_type<tc>, window_params = [{transform_indices = @transform_0, window_bounds = array<i64: 1, 16, 32>}, {transform_indices = @transform_1, window_bounds = array<i64: 1, 16, 32>}, {transform_indices = @transform_2, window_bounds = array<i64: 1, 16, 32>}]} {
    %c0 = arith.constant 0 : index
    %c0_0 = arith.constant 0 : index
    %c0_1 = arith.constant 0 : index
    %0 = vector.load %arg2[%c0, %c0_0, %c0_1] : memref<1x16x32xf32, #tpu.memory_space<vmem>>, vector<1x16x32xf32>
    %cst = arith.constant dense<0.000000e+00> : vector<1x16xf32>
    %1 = vector.multi_reduction <add>, %0, %cst [2] : vector<1x16x32xf32> to vector<1x16xf32>
    %2 = vector.shape_cast %1 : vector<1x16xf32> to vector<1x16x1xf32>
    %cst_2 = arith.constant 3.200000e+01 : f32
    %3 = vector.broadcast %cst_2 : f32 to vector<1x16x1xf32>
    %4 = arith.divf %2, %3 : vector<1x16x1xf32>
    %5 = vector.broadcast %4 : vector<1x16x1xf32> to vector<1x16x32xf32>
    %6 = arith.subf %0, %5 : vector<1x16x32xf32>
    %7 = arith.mulf %6, %6 : vector<1x16x32xf32>
    %cst_3 = arith.constant dense<0.000000e+00> : vector<1x16xf32>
    %8 = vector.multi_reduction <add>, %7, %cst_3 [2] : vector<1x16x32xf32> to vector<1x16xf32>
    %9 = vector.shape_cast %8 : vector<1x16xf32> to vector<1x16x1xf32>
    %cst_4 = arith.constant 3.200000e+01 : f32
    %10 = vector.broadcast %cst_4 : f32 to vector<1x16x1xf32>
    %11 = arith.divf %9, %10 : vector<1x16x1xf32>
    %12 = vector.broadcast %4 : vector<1x16x1xf32> to vector<1x16x32xf32>
    %13 = arith.subf %0, %12 : vector<1x16x32xf32>
    %cst_5 = arith.constant 9.99999974E-6 : f32
    %14 = vector.broadcast %cst_5 : f32 to vector<1x16x1xf32>
    %15 = arith.addf %11, %14 : vector<1x16x1xf32>
    %16 = math.rsqrt %15 : vector<1x16x1xf32>
    %17 = vector.broadcast %16 : vector<1x16x1xf32> to vector<1x16x32xf32>
    %18 = arith.mulf %13, %17 : vector<1x16x32xf32>
    %c0_6 = arith.constant 0 : index
    %c0_7 = arith.constant 0 : index
    %c0_8 = arith.constant 0 : index
    %19 = vector.load %arg3[%c0_6, %c0_7, %c0_8] : memref<1x16x32xf32, #tpu.memory_space<vmem>>, vector<1x16x32xf32>
    %20 = arith.addf %18, %19 : vector<1x16x32xf32>
    %c0_9 = arith.constant 0 : index
    %c0_10 = arith.constant 0 : index
    %c0_11 = arith.constant 0 : index
    %21 = vector.load %arg4[%c0_9, %c0_10, %c0_11] : memref<1x16x32xf32, #tpu.memory_space<vmem>>, vector<1x16x32xf32>
    tpu.vector_store %arg4[%c0_9, %c0_10, %c0_11], %20 {strides = array<i32>} : memref<1x16x32xf32, #tpu.memory_space<vmem>>, vector<1x16x32xf32>,
    return
  }
  func.func @transform_0(%arg0: i32, %arg1: i32) -> (i32, i32, i32) {
    %c0_i32 = arith.constant 0 : i32
    %c0_i32_0 = arith.constant 0 : i32
    return %arg0, %arg1, %c0_i32 : i32, i32, i32
  }
  func.func @transform_1(%arg0: i32, %arg1: i32) -> (i32, i32, i32) {
    %c0_i32 = arith.constant 0 : i32
    %c0_i32_0 = arith.constant 0 : i32
    %c0_i32_1 = arith.constant 0 : i32
    return %c0_i32, %arg1, %c0_i32_0 : i32, i32, i32
  }
  func.func @transform_2(%arg0: i32, %arg1: i32) -> (i32, i32, i32) {
    %c0_i32 = arith.constant 0 : i32
    %c0_i32_0 = arith.constant 0 : i32
    return %arg0, %arg1, %c0_i32 : i32, i32, i32
  }
}

module attributes {stable_mosaic.version = 11 : i64} {
  func.func @_matmul_kernel(%arg0: i32, %arg1: i32, %arg2: i32, %arg3: memref<32x32xf32, #tpu.memory_space<vmem>>, %arg4: memref<32x96xf32, #tpu.memory_space<vmem>>, %arg5: memref<1x96xf32, #tpu.memory_space<vmem>>, %arg6: memref<32x96xf32, #tpu.memory_space<vmem>>, %arg7: memref<32x96xf32, #tpu.memory_space<vmem>>) attributes {dimension_semantics = [#tpu.dimension_semantics<parallel>, #tpu.dimension_semantics<parallel>, #tpu.dimension_semantics<arbitrary>], iteration_bounds = array<i64: 1, 1, 1>, scalar_prefetch = 0 : i64, scratch_operands = 1 : i64, tpu.core_type = #tpu.core_type<tc>, window_params = [{transform_indices = @transform_0, window_bounds = array<i64: 32, 32>}, {transform_indices = @transform_1, window_bounds = array<i64: 32, 96>}, {transform_indices = @transform_2, window_bounds = array<i64: 1, 96>}, {transform_indices = @transform_3, window_bounds = array<i64: 32, 96>}]} {
    %c0_i32 = arith.constant 0 : i32
    %0 = arith.cmpi eq, %arg2, %c0_i32 : i32
    %1 = arith.extui %0 : i1 to i32
    %c0_i32_0 = arith.constant 0 : i32
    %2 = arith.cmpi ne, %1, %c0_i32_0 : i32
    scf.if %2 {
      %cst_10 = arith.constant 0.000000e+00 : f32
      %12 = vector.broadcast %cst_10 : f32 to vector<32x96xf32>
      %c0_11 = arith.constant 0 : index
      %c0_12 = arith.constant 0 : index
      %13 = vector.load %arg7[%c0_11, %c0_12] : memref<32x96xf32, #tpu.memory_space<vmem>>, vector<32x96xf32>
      tpu.vector_store %arg7[%c0_11, %c0_12], %12 {strides = array<i32>} : memref<32x96xf32, #tpu.memory_space<vmem>>, vector<32x96xf32>,
    } else {
    }
    %c0 = arith.constant 0 : index
    %c0_1 = arith.constant 0 : index
    %3 = vector.load %arg7[%c0, %c0_1] : memref<32x96xf32, #tpu.memory_space<vmem>>, vector<32x96xf32>
    %c0_2 = arith.constant 0 : index
    %c0_3 = arith.constant 0 : index
    %4 = vector.load %arg3[%c0_2, %c0_3] : memref<32x32xf32, #tpu.memory_space<vmem>>, vector<32x32xf32>
    %c0_4 = arith.constant 0 : index
    %c0_5 = arith.constant 0 : index
    %5 = vector.load %arg4[%c0_4, %c0_5] : memref<32x96xf32, #tpu.memory_space<vmem>>, vector<32x96xf32>
    %cst = arith.constant dense<0.000000e+00> : vector<32x96xf32>
    %6 = tpu.matmul %4, %5, %cst {dimension_numbers = #tpu.dot_dimension_numbers<[1], [0], [0], [1], [0, 0, 1, 1], [], []>} : vector<32x32xf32>, vector<32x96xf32>, vector<32x96xf32> -> vector<32x96xf32>
    %7 = arith.addf %3, %6 : vector<32x96xf32>
    %c0_6 = arith.constant 0 : index
    %c0_7 = arith.constant 0 : index
    %8 = vector.load %arg7[%c0_6, %c0_7] : memref<32x96xf32, #tpu.memory_space<vmem>>, vector<32x96xf32>
    tpu.vector_store %arg7[%c0_6, %c0_7], %7 {strides = array<i32>} : memref<32x96xf32, #tpu.memory_space<vmem>>, vector<32x96xf32>,
    %c0_i32_8 = arith.constant 0 : i32
    %9 = arith.cmpi eq, %arg2, %c0_i32_8 : i32
    %10 = arith.extui %9 : i1 to i32
    %c0_i32_9 = arith.constant 0 : i32
    %11 = arith.cmpi ne, %10, %c0_i32_9 : i32
    scf.if %11 {
      %c0_10 = arith.constant 0 : index
      %c0_11 = arith.constant 0 : index
      %12 = vector.load %arg7[%c0_10, %c0_11] : memref<32x96xf32, #tpu.memory_space<vmem>>, vector<32x96xf32>
      %c0_12 = arith.constant 0 : index
      %c0_13 = arith.constant 0 : index
      %13 = vector.load %arg5[%c0_12, %c0_13] : memref<1x96xf32, #tpu.memory_space<vmem>>, vector<1x96xf32>
      %14 = vector.broadcast %13 : vector<1x96xf32> to vector<32x96xf32>
      %15 = arith.addf %12, %14 : vector<32x96xf32>
      %c0_14 = arith.constant 0 : index
      %c0_15 = arith.constant 0 : index
      %16 = vector.load %arg6[%c0_14, %c0_15] : memref<32x96xf32, #tpu.memory_space<vmem>>, vector<32x96xf32>
      tpu.vector_store %arg6[%c0_14, %c0_15], %15 {strides = array<i32>} : memref<32x96xf32, #tpu.memory_space<vmem>>, vector<32x96xf32>,
    } else {
    }
    return
  }
  func.func @transform_0(%arg0: i32, %arg1: i32, %arg2: i32) -> (i32, i32) {
    %c0_i32 = arith.constant 0 : i32
    return %arg0, %arg2 : i32, i32
  }
  func.func @transform_1(%arg0: i32, %arg1: i32, %arg2: i32) -> (i32, i32) {
    %c0_i32 = arith.constant 0 : i32
    return %arg2, %arg1 : i32, i32
  }
  func.func @transform_2(%arg0: i32, %arg1: i32, %arg2: i32) -> (i32, i32) {
    %c0_i32 = arith.constant 0 : i32
    %c0_i32_0 = arith.constant 0 : i32
    return %c0_i32, %arg1 : i32, i32
  }
  func.func @transform_3(%arg0: i32, %arg1: i32, %arg2: i32) -> (i32, i32) {
    %c0_i32 = arith.constant 0 : i32
    return %arg0, %arg1 : i32, i32
  }
}

module attributes {stable_mosaic.version = 11 : i64} {
  func.func @_flash_attn_kernel(%arg0: i32, %arg1: i32, %arg2: i32, %arg3: memref<1x16x8xf32, #tpu.memory_space<vmem>>, %arg4: memref<1x16x8xf32, #tpu.memory_space<vmem>>, %arg5: memref<1x16x8xf32, #tpu.memory_space<vmem>>, %arg6: memref<1x16x8xf32, #tpu.memory_space<vmem>>, %arg7: memref<16x1xf32, #tpu.memory_space<vmem>>, %arg8: memref<16x1xf32, #tpu.memory_space<vmem>>, %arg9: memref<16x8xf32, #tpu.memory_space<vmem>>) attributes {dimension_semantics = [#tpu.dimension_semantics<parallel>, #tpu.dimension_semantics<parallel>, #tpu.dimension_semantics<arbitrary>], iteration_bounds = array<i64: 8, 1, 1>, scalar_prefetch = 0 : i64, scratch_operands = 3 : i64, tpu.core_type = #tpu.core_type<tc>, window_params = [{transform_indices = @transform_0, window_bounds = array<i64: 1, 16, 8>}, {transform_indices = @transform_1, window_bounds = array<i64: 1, 16, 8>}, {transform_indices = @transform_2, window_bounds = array<i64: 1, 16, 8>}, {transform_indices = @transform_3, window_bounds = array<i64: 1, 16, 8>}]} {
    %c0_i32 = arith.constant 0 : i32
    %0 = arith.cmpi eq, %arg2, %c0_i32 : i32
    %1 = arith.extui %0 : i1 to i32
    %c0_i32_0 = arith.constant 0 : i32
    %2 = arith.cmpi ne, %1, %c0_i32_0 : i32
    scf.if %2 {
      %cst_37 = arith.constant 0xFF800000 : f32
      %73 = vector.broadcast %cst_37 : f32 to vector<16x1xf32>
      %c0_38 = arith.constant 0 : index
      %c0_39 = arith.constant 0 : index
      %74 = vector.load %arg7[%c0_38, %c0_39] : memref<16x1xf32, #tpu.memory_space<vmem>>, vector<16x1xf32>
      tpu.vector_store %arg7[%c0_38, %c0_39], %73 {strides = array<i32>} : memref<16x1xf32, #tpu.memory_space<vmem>>, vector<16x1xf32>,
      %cst_40 = arith.constant 0.000000e+00 : f32
      %75 = vector.broadcast %cst_40 : f32 to vector<16x1xf32>
      %c0_41 = arith.constant 0 : index
      %c0_42 = arith.constant 0 : index
      %76 = vector.load %arg8[%c0_41, %c0_42] : memref<16x1xf32, #tpu.memory_space<vmem>>, vector<16x1xf32>
      tpu.vector_store %arg8[%c0_41, %c0_42], %75 {strides = array<i32>} : memref<16x1xf32, #tpu.memory_space<vmem>>, vector<16x1xf32>,
      %cst_43 = arith.constant 0.000000e+00 : f32
      %77 = vector.broadcast %cst_43 : f32 to vector<16x8xf32>
      %c0_44 = arith.constant 0 : index
      %c0_45 = arith.constant 0 : index
      %78 = vector.load %arg9[%c0_44, %c0_45] : memref<16x8xf32, #tpu.memory_space<vmem>>, vector<16x8xf32>
      tpu.vector_store %arg9[%c0_44, %c0_45], %77 {strides = array<i32>} : memref<16x8xf32, #tpu.memory_space<vmem>>, vector<16x8xf32>,
    } else {
    }
    %c0 = arith.constant 0 : index
    %c0_1 = arith.constant 0 : index
    %c0_2 = arith.constant 0 : index
    %3 = vector.load %arg3[%c0, %c0_1, %c0_2] : memref<1x16x8xf32, #tpu.memory_space<vmem>>, vector<1x16x8xf32>
    %4 = vector.shape_cast %3 : vector<1x16x8xf32> to vector<16x8xf32>
    %cst = arith.constant dense<0.000000e+00> : vector<16xf32>
    %5 = vector.multi_reduction <add>, %4, %cst [1] : vector<16x8xf32> to vector<16xf32>
    %6 = vector.shape_cast %5 : vector<16xf32> to vector<16x1xf32>
    %cst_3 = arith.constant 8.000000e+00 : f32
    %7 = vector.broadcast %cst_3 : f32 to vector<16x1xf32>
    %8 = arith.divf %6, %7 : vector<16x1xf32>
    %9 = vector.broadcast %8 : vector<16x1xf32> to vector<16x8xf32>
    %10 = arith.subf %4, %9 : vector<16x8xf32>
    %11 = arith.mulf %10, %10 : vector<16x8xf32>
    %cst_4 = arith.constant dense<0.000000e+00> : vector<16xf32>
    %12 = vector.multi_reduction <add>, %11, %cst_4 [1] : vector<16x8xf32> to vector<16xf32>
    %13 = vector.shape_cast %12 : vector<16xf32> to vector<16x1xf32>
    %cst_5 = arith.constant 8.000000e+00 : f32
    %14 = vector.broadcast %cst_5 : f32 to vector<16x1xf32>
    %15 = arith.divf %13, %14 : vector<16x1xf32>
    %16 = vector.broadcast %8 : vector<16x1xf32> to vector<16x8xf32>
    %17 = arith.subf %4, %16 : vector<16x8xf32>
    %cst_6 = arith.constant 9.99999974E-6 : f32
    %18 = vector.broadcast %cst_6 : f32 to vector<16x1xf32>
    %19 = arith.addf %15, %18 : vector<16x1xf32>
    %20 = math.rsqrt %19 : vector<16x1xf32>
    %21 = vector.broadcast %20 : vector<16x1xf32> to vector<16x8xf32>
    %22 = arith.mulf %17, %21 : vector<16x8xf32>
    %cst_7 = arith.constant 0.176776692 : f32
    %23 = vector.broadcast %cst_7 : f32 to vector<16x8xf32>
    %24 = arith.mulf %22, %23 : vector<16x8xf32>
    %c0_8 = arith.constant 0 : index
    %c0_9 = arith.constant 0 : index
    %c0_10 = arith.constant 0 : index
    %25 = vector.load %arg4[%c0_8, %c0_9, %c0_10] : memref<1x16x8xf32, #tpu.memory_space<vmem>>, vector<1x16x8xf32>
    %26 = vector.shape_cast %25 : vector<1x16x8xf32> to vector<16x8xf32>
    %cst_11 = arith.constant dense<0.000000e+00> : vector<16xf32>
    %27 = vector.multi_reduction <add>, %26, %cst_11 [1] : vector<16x8xf32> to vector<16xf32>
    %28 = vector.shape_cast %27 : vector<16xf32> to vector<16x1xf32>
    %cst_12 = arith.constant 8.000000e+00 : f32
    %29 = vector.broadcast %cst_12 : f32 to vector<16x1xf32>
    %30 = arith.divf %28, %29 : vector<16x1xf32>
    %31 = vector.broadcast %30 : vector<16x1xf32> to vector<16x8xf32>
    %32 = arith.subf %26, %31 : vector<16x8xf32>
    %33 = arith.mulf %32, %32 : vector<16x8xf32>
    %cst_13 = arith.constant dense<0.000000e+00> : vector<16xf32>
    %34 = vector.multi_reduction <add>, %33, %cst_13 [1] : vector<16x8xf32> to vector<16xf32>
    %35 = vector.shape_cast %34 : vector<16xf32> to vector<16x1xf32>
    %cst_14 = arith.constant 8.000000e+00 : f32
    %36 = vector.broadcast %cst_14 : f32 to vector<16x1xf32>
    %37 = arith.divf %35, %36 : vector<16x1xf32>
    %38 = vector.broadcast %30 : vector<16x1xf32> to vector<16x8xf32>
    %39 = arith.subf %26, %38 : vector<16x8xf32>
    %cst_15 = arith.constant 9.99999974E-6 : f32
    %40 = vector.broadcast %cst_15 : f32 to vector<16x1xf32>
    %41 = arith.addf %37, %40 : vector<16x1xf32>
    %42 = math.rsqrt %41 : vector<16x1xf32>
    %43 = vector.broadcast %42 : vector<16x1xf32> to vector<16x8xf32>
    %44 = arith.mulf %39, %43 : vector<16x8xf32>
    %cst_16 = arith.constant dense<0.000000e+00> : vector<16x16xf32>
    %45 = tpu.matmul %24, %44, %cst_16 {dimension_numbers = #tpu.dot_dimension_numbers<[1], [1], [0], [0], [0, 0, 1, 0], [], []>} : vector<16x8xf32>, vector<16x8xf32>, vector<16x16xf32> -> vector<16x16xf32>
    %c0_17 = arith.constant 0 : index
    %c0_18 = arith.constant 0 : index
    %46 = vector.load %arg7[%c0_17, %c0_18] : memref<16x1xf32, #tpu.memory_space<vmem>>, vector<16x1xf32>
    %cst_19 = arith.constant dense<0xFF800000> : vector<16xf32>
    %47 = vector.multi_reduction <maximumf>, %45, %cst_19 [1] : vector<16x16xf32> to vector<16xf32>
    %48 = vector.shape_cast %47 : vector<16xf32> to vector<16x1xf32>
    %49 = arith.maximumf %46, %48 : vector<16x1xf32>
    %50 = arith.subf %46, %49 : vector<16x1xf32>
    %51 = math.exp %50 : vector<16x1xf32>
    %52 = vector.broadcast %49 : vector<16x1xf32> to vector<16x16xf32>
    %53 = arith.subf %45, %52 : vector<16x16xf32>
    %54 = math.exp %53 : vector<16x16xf32>
    %c0_20 = arith.constant 0 : index
    %c0_21 = arith.constant 0 : index
    %55 = vector.load %arg8[%c0_20, %c0_21] : memref<16x1xf32, #tpu.memory_space<vmem>>, vector<16x1xf32>
    %56 = arith.mulf %51, %55 : vector<16x1xf32>
    %cst_22 = arith.constant dense<0.000000e+00> : vector<16xf32>
    %57 = vector.multi_reduction <add>, %54, %cst_22 [1] : vector<16x16xf32> to vector<16xf32>
    %58 = vector.shape_cast %57 : vector<16xf32> to vector<16x1xf32>
    %59 = arith.addf %56, %58 : vector<16x1xf32>
    %c0_23 = arith.constant 0 : index
    %c0_24 = arith.constant 0 : index
    %60 = vector.load %arg8[%c0_23, %c0_24] : memref<16x1xf32, #tpu.memory_space<vmem>>, vector<16x1xf32>
    tpu.vector_store %arg8[%c0_23, %c0_24], %59 {strides = array<i32>} : memref<16x1xf32, #tpu.memory_space<vmem>>, vector<16x1xf32>,
    %c0_25 = arith.constant 0 : index
    %c0_26 = arith.constant 0 : index
    %61 = vector.load %arg9[%c0_25, %c0_26] : memref<16x8xf32, #tpu.memory_space<vmem>>, vector<16x8xf32>
    %62 = vector.broadcast %51 : vector<16x1xf32> to vector<16x8xf32>
    %63 = arith.mulf %62, %61 : vector<16x8xf32>
    %c0_27 = arith.constant 0 : index
    %c0_28 = arith.constant 0 : index
    %c0_29 = arith.constant 0 : index
    %64 = vector.load %arg5[%c0_27, %c0_28, %c0_29] : memref<1x16x8xf32, #tpu.memory_space<vmem>>, vector<1x16x8xf32>
    %65 = vector.shape_cast %64 : vector<1x16x8xf32> to vector<16x8xf32>
    %cst_30 = arith.constant dense<0.000000e+00> : vector<16x8xf32>
    %66 = tpu.matmul %54, %65, %cst_30 {dimension_numbers = #tpu.dot_dimension_numbers<[1], [0], [0], [1], [0, 0, 1, 1], [], []>} : vector<16x16xf32>, vector<16x8xf32>, vector<16x8xf32> -> vector<16x8xf32>
    %67 = arith.addf %63, %66 : vector<16x8xf32>
    %c0_31 = arith.constant 0 : index
    %c0_32 = arith.constant 0 : index
    %68 = vector.load %arg9[%c0_31, %c0_32] : memref<16x8xf32, #tpu.memory_space<vmem>>, vector<16x8xf32>
    tpu.vector_store %arg9[%c0_31, %c0_32], %67 {strides = array<i32>} : memref<16x8xf32, #tpu.memory_space<vmem>>, vector<16x8xf32>,
    %c0_33 = arith.constant 0 : index
    %c0_34 = arith.constant 0 : index
    %69 = vector.load %arg7[%c0_33, %c0_34] : memref<16x1xf32, #tpu.memory_space<vmem>>, vector<16x1xf32>
    tpu.vector_store %arg7[%c0_33, %c0_34], %49 {strides = array<i32>} : memref<16x1xf32, #tpu.memory_space<vmem>>, vector<16x1xf32>,
    %c0_i32_35 = arith.constant 0 : i32
    %70 = arith.cmpi eq, %arg2, %c0_i32_35 : i32
    %71 = arith.extui %70 : i1 to i32
    %c0_i32_36 = arith.constant 0 : i32
    %72 = arith.cmpi ne, %71, %c0_i32_36 : i32
    scf.if %72 {
      %c0_37 = arith.constant 0 : index
      %c0_38 = arith.constant 0 : index
      %73 = vector.load %arg8[%c0_37, %c0_38] : memref<16x1xf32, #tpu.memory_space<vmem>>, vector<16x1xf32>
      %74 = tpu.reciprocal %73 : vector<16x1xf32> -> vector<16x1xf32>
      %c0_39 = arith.constant 0 : index
      %c0_40 = arith.constant 0 : index
      %75 = vector.load %arg9[%c0_39, %c0_40] : memref<16x8xf32, #tpu.memory_space<vmem>>, vector<16x8xf32>
      %76 = vector.broadcast %74 : vector<16x1xf32> to vector<16x8xf32>
      %77 = arith.mulf %75, %76 : vector<16x8xf32>
      %c0_41 = arith.constant 0 : index
      %c0_42 = arith.constant 0 : index
      %c0_43 = arith.constant 0 : index
      %78 = vector.load %arg6[%c0_41, %c0_42, %c0_43] : memref<1x16x8xf32, #tpu.memory_space<vmem>>, vector<1x16x8xf32>
      %79 = vector.shape_cast %78 : vector<1x16x8xf32> to vector<16x8xf32>
      %80 = vector.shape_cast %77 : vector<16x8xf32> to vector<1x16x8xf32>
      tpu.vector_store %arg6[%c0_41, %c0_42, %c0_43], %80 {strides = array<i32>} : memref<1x16x8xf32, #tpu.memory_space<vmem>>, vector<1x16x8xf32>,
    } else {
    }
    return
  }
  func.func @transform_0(%arg0: i32, %arg1: i32, %arg2: i32) -> (i32, i32, i32) {
    %c0_i32 = arith.constant 0 : i32
    %c0_i32_0 = arith.constant 0 : i32
    return %arg0, %arg1, %c0_i32 : i32, i32, i32
  }
  func.func @transform_1(%arg0: i32, %arg1: i32, %arg2: i32) -> (i32, i32, i32) {
    %c0_i32 = arith.constant 0 : i32
    %c0_i32_0 = arith.constant 0 : i32
    return %arg0, %arg2, %c0_i32 : i32, i32, i32
  }
  func.func @transform_2(%arg0: i32, %arg1: i32, %arg2: i32) -> (i32, i32, i32) {
    %c0_i32 = arith.constant 0 : i32
    %c0_i32_0 = arith.constant 0 : i32
    return %arg0, %arg2, %c0_i32 : i32, i32, i32
  }
  func.func @transform_3(%arg0: i32, %arg1: i32, %arg2: i32) -> (i32, i32, i32) {
    %c0_i32 = arith.constant 0 : i32
    %c0_i32_0 = arith.constant 0 : i32
    return %arg0, %arg1, %c0_i32 : i32, i32, i32
  }
}

module attributes {stable_mosaic.version = 11 : i64} {
  func.func @_matmul_kernel(%arg0: i32, %arg1: i32, %arg2: i32, %arg3: memref<32x32xf32, #tpu.memory_space<vmem>>, %arg4: memref<32x32xf32, #tpu.memory_space<vmem>>, %arg5: memref<1x32xf32, #tpu.memory_space<vmem>>, %arg6: memref<32x32xf32, #tpu.memory_space<vmem>>, %arg7: memref<32x32xf32, #tpu.memory_space<vmem>>) attributes {dimension_semantics = [#tpu.dimension_semantics<parallel>, #tpu.dimension_semantics<parallel>, #tpu.dimension_semantics<arbitrary>], iteration_bounds = array<i64: 1, 1, 1>, scalar_prefetch = 0 : i64, scratch_operands = 1 : i64, tpu.core_type = #tpu.core_type<tc>, window_params = [{transform_indices = @transform_0, window_bounds = array<i64: 32, 32>}, {transform_indices = @transform_1, window_bounds = array<i64: 32, 32>}, {transform_indices = @transform_2, window_bounds = array<i64: 1, 32>}, {transform_indices = @transform_3, window_bounds = array<i64: 32, 32>}]} {
    %c0_i32 = arith.constant 0 : i32
    %0 = arith.cmpi eq, %arg2, %c0_i32 : i32
    %1 = arith.extui %0 : i1 to i32
    %c0_i32_0 = arith.constant 0 : i32
    %2 = arith.cmpi ne, %1, %c0_i32_0 : i32
    scf.if %2 {
      %cst_10 = arith.constant 0.000000e+00 : f32
      %12 = vector.broadcast %cst_10 : f32 to vector<32x32xf32>
      %c0_11 = arith.constant 0 : index
      %c0_12 = arith.constant 0 : index
      %13 = vector.load %arg7[%c0_11, %c0_12] : memref<32x32xf32, #tpu.memory_space<vmem>>, vector<32x32xf32>
      tpu.vector_store %arg7[%c0_11, %c0_12], %12 {strides = array<i32>} : memref<32x32xf32, #tpu.memory_space<vmem>>, vector<32x32xf32>,
    } else {
    }
    %c0 = arith.constant 0 : index
    %c0_1 = arith.constant 0 : index
    %3 = vector.load %arg7[%c0, %c0_1] : memref<32x32xf32, #tpu.memory_space<vmem>>, vector<32x32xf32>
    %c0_2 = arith.constant 0 : index
    %c0_3 = arith.constant 0 : index
    %4 = vector.load %arg3[%c0_2, %c0_3] : memref<32x32xf32, #tpu.memory_space<vmem>>, vector<32x32xf32>
    %c0_4 = arith.constant 0 : index
    %c0_5 = arith.constant 0 : index
    %5 = vector.load %arg4[%c0_4, %c0_5] : memref<32x32xf32, #tpu.memory_space<vmem>>, vector<32x32xf32>
    %cst = arith.constant dense<0.000000e+00> : vector<32x32xf32>
    %6 = tpu.matmul %4, %5, %cst {dimension_numbers = #tpu.dot_dimension_numbers<[1], [0], [0], [1], [0, 0, 1, 1], [], []>} : vector<32x32xf32>, vector<32x32xf32>, vector<32x32xf32> -> vector<32x32xf32>
    %7 = arith.addf %3, %6 : vector<32x32xf32>
    %c0_6 = arith.constant 0 : index
    %c0_7 = arith.constant 0 : index
    %8 = vector.load %arg7[%c0_6, %c0_7] : memref<32x32xf32, #tpu.memory_space<vmem>>, vector<32x32xf32>
    tpu.vector_store %arg7[%c0_6, %c0_7], %7 {strides = array<i32>} : memref<32x32xf32, #tpu.memory_space<vmem>>, vector<32x32xf32>,
    %c0_i32_8 = arith.constant 0 : i32
    %9 = arith.cmpi eq, %arg2, %c0_i32_8 : i32
    %10 = arith.extui %9 : i1 to i32
    %c0_i32_9 = arith.constant 0 : i32
    %11 = arith.cmpi ne, %10, %c0_i32_9 : i32
    scf.if %11 {
      %c0_10 = arith.constant 0 : index
      %c0_11 = arith.constant 0 : index
      %12 = vector.load %arg7[%c0_10, %c0_11] : memref<32x32xf32, #tpu.memory_space<vmem>>, vector<32x32xf32>
      %c0_12 = arith.constant 0 : index
      %c0_13 = arith.constant 0 : index
      %13 = vector.load %arg5[%c0_12, %c0_13] : memref<1x32xf32, #tpu.memory_space<vmem>>, vector<1x32xf32>
      %14 = vector.broadcast %13 : vector<1x32xf32> to vector<32x32xf32>
      %15 = arith.addf %12, %14 : vector<32x32xf32>
      %c0_14 = arith.constant 0 : index
      %c0_15 = arith.constant 0 : index
      %16 = vector.load %arg6[%c0_14, %c0_15] : memref<32x32xf32, #tpu.memory_space<vmem>>, vector<32x32xf32>
      tpu.vector_store %arg6[%c0_14, %c0_15], %15 {strides = array<i32>} : memref<32x32xf32, #tpu.memory_space<vmem>>, vector<32x32xf32>,
    } else {
    }
    return
  }
  func.func @transform_0(%arg0: i32, %arg1: i32, %arg2: i32) -> (i32, i32) {
    %c0_i32 = arith.constant 0 : i32
    return %arg0, %arg2 : i32, i32
  }
  func.func @transform_1(%arg0: i32, %arg1: i32, %arg2: i32) -> (i32, i32) {
    %c0_i32 = arith.constant 0 : i32
    return %arg2, %arg1 : i32, i32
  }
  func.func @transform_2(%arg0: i32, %arg1: i32, %arg2: i32) -> (i32, i32) {
    %c0_i32 = arith.constant 0 : i32
    %c0_i32_0 = arith.constant 0 : i32
    return %c0_i32, %arg1 : i32, i32
  }
  func.func @transform_3(%arg0: i32, %arg1: i32, %arg2: i32) -> (i32, i32) {
    %c0_i32 = arith.constant 0 : i32
    return %arg0, %arg1 : i32, i32
  }
}

module attributes {stable_mosaic.version = 11 : i64} {
  func.func @_matmul_kernel(%arg0: i32, %arg1: i32, %arg2: i32, %arg3: memref<32x64xf32, #tpu.memory_space<vmem>>, %arg4: memref<64x64xf32, #tpu.memory_space<vmem>>, %arg5: memref<1x64xf32, #tpu.memory_space<vmem>>, %arg6: memref<32x64xf32, #tpu.memory_space<vmem>>, %arg7: memref<32x64xf32, #tpu.memory_space<vmem>>) attributes {dimension_semantics = [#tpu.dimension_semantics<parallel>, #tpu.dimension_semantics<parallel>, #tpu.dimension_semantics<arbitrary>], iteration_bounds = array<i64: 1, 1, 1>, scalar_prefetch = 0 : i64, scratch_operands = 1 : i64, tpu.core_type = #tpu.core_type<tc>, window_params = [{transform_indices = @transform_0, window_bounds = array<i64: 32, 64>}, {transform_indices = @transform_1, window_bounds = array<i64: 64, 64>}, {transform_indices = @transform_2, window_bounds = array<i64: 1, 64>}, {transform_indices = @transform_3, window_bounds = array<i64: 32, 64>}]} {
    %c0_i32 = arith.constant 0 : i32
    %0 = arith.cmpi eq, %arg2, %c0_i32 : i32
    %1 = arith.extui %0 : i1 to i32
    %c0_i32_0 = arith.constant 0 : i32
    %2 = arith.cmpi ne, %1, %c0_i32_0 : i32
    scf.if %2 {
      %cst_10 = arith.constant 0.000000e+00 : f32
      %12 = vector.broadcast %cst_10 : f32 to vector<32x64xf32>
      %c0_11 = arith.constant 0 : index
      %c0_12 = arith.constant 0 : index
      %13 = vector.load %arg7[%c0_11, %c0_12] : memref<32x64xf32, #tpu.memory_space<vmem>>, vector<32x64xf32>
      tpu.vector_store %arg7[%c0_11, %c0_12], %12 {strides = array<i32>} : memref<32x64xf32, #tpu.memory_space<vmem>>, vector<32x64xf32>,
    } else {
    }
    %c0 = arith.constant 0 : index
    %c0_1 = arith.constant 0 : index
    %3 = vector.load %arg7[%c0, %c0_1] : memref<32x64xf32, #tpu.memory_space<vmem>>, vector<32x64xf32>
    %c0_2 = arith.constant 0 : index
    %c0_3 = arith.constant 0 : index
    %4 = vector.load %arg3[%c0_2, %c0_3] : memref<32x64xf32, #tpu.memory_space<vmem>>, vector<32x64xf32>
    %c0_4 = arith.constant 0 : index
    %c0_5 = arith.constant 0 : index
    %5 = vector.load %arg4[%c0_4, %c0_5] : memref<64x64xf32, #tpu.memory_space<vmem>>, vector<64x64xf32>
    %cst = arith.constant dense<0.000000e+00> : vector<32x64xf32>
    %6 = tpu.matmul %4, %5, %cst {dimension_numbers = #tpu.dot_dimension_numbers<[1], [0], [0], [1], [0, 0, 1, 1], [], []>} : vector<32x64xf32>, vector<64x64xf32>, vector<32x64xf32> -> vector<32x64xf32>
    %7 = arith.addf %3, %6 : vector<32x64xf32>
    %c0_6 = arith.constant 0 : index
    %c0_7 = arith.constant 0 : index
    %8 = vector.load %arg7[%c0_6, %c0_7] : memref<32x64xf32, #tpu.memory_space<vmem>>, vector<32x64xf32>
    tpu.vector_store %arg7[%c0_6, %c0_7], %7 {strides = array<i32>} : memref<32x64xf32, #tpu.memory_space<vmem>>, vector<32x64xf32>,
    %c0_i32_8 = arith.constant 0 : i32
    %9 = arith.cmpi eq, %arg2, %c0_i32_8 : i32
    %10 = arith.extui %9 : i1 to i32
    %c0_i32_9 = arith.constant 0 : i32
    %11 = arith.cmpi ne, %10, %c0_i32_9 : i32
    scf.if %11 {
      %c0_10 = arith.constant 0 : index
      %c0_11 = arith.constant 0 : index
      %12 = vector.load %arg7[%c0_10, %c0_11] : memref<32x64xf32, #tpu.memory_space<vmem>>, vector<32x64xf32>
      %c0_12 = arith.constant 0 : index
      %c0_13 = arith.constant 0 : index
      %13 = vector.load %arg5[%c0_12, %c0_13] : memref<1x64xf32, #tpu.memory_space<vmem>>, vector<1x64xf32>
      %14 = vector.broadcast %13 : vector<1x64xf32> to vector<32x64xf32>
      %15 = arith.addf %12, %14 : vector<32x64xf32>
      %16 = math.tanh %15 : vector<32x64xf32>
      %c0_14 = arith.constant 0 : index
      %c0_15 = arith.constant 0 : index
      %17 = vector.load %arg6[%c0_14, %c0_15] : memref<32x64xf32, #tpu.memory_space<vmem>>, vector<32x64xf32>
      tpu.vector_store %arg6[%c0_14, %c0_15], %16 {strides = array<i32>} : memref<32x64xf32, #tpu.memory_space<vmem>>, vector<32x64xf32>,
    } else {
    }
    return
  }
  func.func @transform_0(%arg0: i32, %arg1: i32, %arg2: i32) -> (i32, i32) {
    %c0_i32 = arith.constant 0 : i32
    return %arg0, %arg2 : i32, i32
  }
  func.func @transform_1(%arg0: i32, %arg1: i32, %arg2: i32) -> (i32, i32) {
    %c0_i32 = arith.constant 0 : i32
    return %arg2, %arg1 : i32, i32
  }
  func.func @transform_2(%arg0: i32, %arg1: i32, %arg2: i32) -> (i32, i32) {
    %c0_i32 = arith.constant 0 : i32
    %c0_i32_0 = arith.constant 0 : i32
    return %c0_i32, %arg1 : i32, i32
  }
  func.func @transform_3(%arg0: i32, %arg1: i32, %arg2: i32) -> (i32, i32) {
    %c0_i32 = arith.constant 0 : i32
    return %arg0, %arg1 : i32, i32
  }
}

module attributes {stable_mosaic.version = 11 : i64} {
  func.func @_matmul_kernel(%arg0: i32, %arg1: i32, %arg2: i32, %arg3: memref<32x32xf32, #tpu.memory_space<vmem>>, %arg4: memref<32x64xf32, #tpu.memory_space<vmem>>, %arg5: memref<1x64xf32, #tpu.memory_space<vmem>>, %arg6: memref<32x64xf32, #tpu.memory_space<vmem>>, %arg7: memref<32x64xf32, #tpu.memory_space<vmem>>) attributes {dimension_semantics = [#tpu.dimension_semantics<parallel>, #tpu.dimension_semantics<parallel>, #tpu.dimension_semantics<arbitrary>], iteration_bounds = array<i64: 1, 1, 1>, scalar_prefetch = 0 : i64, scratch_operands = 1 : i64, tpu.core_type = #tpu.core_type<tc>, window_params = [{transform_indices = @transform_0, window_bounds = array<i64: 32, 32>}, {transform_indices = @transform_1, window_bounds = array<i64: 32, 64>}, {transform_indices = @transform_2, window_bounds = array<i64: 1, 64>}, {transform_indices = @transform_3, window_bounds = array<i64: 32, 64>}]} {
    %c0_i32 = arith.constant 0 : i32
    %0 = arith.cmpi eq, %arg2, %c0_i32 : i32
    %1 = arith.extui %0 : i1 to i32
    %c0_i32_0 = arith.constant 0 : i32
    %2 = arith.cmpi ne, %1, %c0_i32_0 : i32
    scf.if %2 {
      %cst_10 = arith.constant 0.000000e+00 : f32
      %12 = vector.broadcast %cst_10 : f32 to vector<32x64xf32>
      %c0_11 = arith.constant 0 : index
      %c0_12 = arith.constant 0 : index
      %13 = vector.load %arg7[%c0_11, %c0_12] : memref<32x64xf32, #tpu.memory_space<vmem>>, vector<32x64xf32>
      tpu.vector_store %arg7[%c0_11, %c0_12], %12 {strides = array<i32>} : memref<32x64xf32, #tpu.memory_space<vmem>>, vector<32x64xf32>,
    } else {
    }
    %c0 = arith.constant 0 : index
    %c0_1 = arith.constant 0 : index
    %3 = vector.load %arg7[%c0, %c0_1] : memref<32x64xf32, #tpu.memory_space<vmem>>, vector<32x64xf32>
    %c0_2 = arith.constant 0 : index
    %c0_3 = arith.constant 0 : index
    %4 = vector.load %arg3[%c0_2, %c0_3] : memref<32x32xf32, #tpu.memory_space<vmem>>, vector<32x32xf32>
    %c0_4 = arith.constant 0 : index
    %c0_5 = arith.constant 0 : index
    %5 = vector.load %arg4[%c0_4, %c0_5] : memref<32x64xf32, #tpu.memory_space<vmem>>, vector<32x64xf32>
    %cst = arith.constant dense<0.000000e+00> : vector<32x64xf32>
    %6 = tpu.matmul %4, %5, %cst {dimension_numbers = #tpu.dot_dimension_numbers<[1], [0], [0], [1], [0, 0, 1, 1], [], []>} : vector<32x32xf32>, vector<32x64xf32>, vector<32x64xf32> -> vector<32x64xf32>
    %7 = arith.addf %3, %6 : vector<32x64xf32>
    %c0_6 = arith.constant 0 : index
    %c0_7 = arith.constant 0 : index
    %8 = vector.load %arg7[%c0_6, %c0_7] : memref<32x64xf32, #tpu.memory_space<vmem>>, vector<32x64xf32>
    tpu.vector_store %arg7[%c0_6, %c0_7], %7 {strides = array<i32>} : memref<32x64xf32, #tpu.memory_space<vmem>>, vector<32x64xf32>,
    %c0_i32_8 = arith.constant 0 : i32
    %9 = arith.cmpi eq, %arg2, %c0_i32_8 : i32
    %10 = arith.extui %9 : i1 to i32
    %c0_i32_9 = arith.constant 0 : i32
    %11 = arith.cmpi ne, %10, %c0_i32_9 : i32
    scf.if %11 {
      %c0_10 = arith.constant 0 : index
      %c0_11 = arith.constant 0 : index
      %12 = vector.load %arg7[%c0_10, %c0_11] : memref<32x64xf32, #tpu.memory_space<vmem>>, vector<32x64xf32>
      %c0_12 = arith.constant 0 : index
      %c0_13 = arith.constant 0 : index
      %13 = vector.load %arg5[%c0_12, %c0_13] : memref<1x64xf32, #tpu.memory_space<vmem>>, vector<1x64xf32>
      %14 = vector.broadcast %13 : vector<1x64xf32> to vector<32x64xf32>
      %15 = arith.addf %12, %14 : vector<32x64xf32>
      %cst_14 = arith.constant 5.000000e-01 : f32
      %16 = vector.broadcast %cst_14 : f32 to vector<32x64xf32>
      %17 = arith.mulf %16, %15 : vector<32x64xf32>
      %cst_15 = arith.constant 0.707106769 : f32
      %18 = vector.broadcast %cst_15 : f32 to vector<32x64xf32>
      %19 = arith.mulf %15, %18 : vector<32x64xf32>
      %20 = math.erf %19 : vector<32x64xf32>
      %cst_16 = arith.constant 1.000000e+00 : f32
      %21 = vector.broadcast %cst_16 : f32 to vector<32x64xf32>
      %22 = arith.addf %21, %20 : vector<32x64xf32>
      %23 = arith.mulf %17, %22 : vector<32x64xf32>
      %c0_17 = arith.constant 0 : index
      %c0_18 = arith.constant 0 : index
      %24 = vector.load %arg6[%c0_17, %c0_18] : memref<32x64xf32, #tpu.memory_space<vmem>>, vector<32x64xf32>
      tpu.vector_store %arg6[%c0_17, %c0_18], %23 {strides = array<i32>} : memref<32x64xf32, #tpu.memory_space<vmem>>, vector<32x64xf32>,
    } else {
    }
    return
  }
  func.func @transform_0(%arg0: i32, %arg1: i32, %arg2: i32) -> (i32, i32) {
    %c0_i32 = arith.constant 0 : i32
    return %arg0, %arg2 : i32, i32
  }
  func.func @transform_1(%arg0: i32, %arg1: i32, %arg2: i32) -> (i32, i32) {
    %c0_i32 = arith.constant 0 : i32
    return %arg2, %arg1 : i32, i32
  }
  func.func @transform_2(%arg0: i32, %arg1: i32, %arg2: i32) -> (i32, i32) {
    %c0_i32 = arith.constant 0 : i32
    %c0_i32_0 = arith.constant 0 : i32
    return %c0_i32, %arg1 : i32, i32
  }
  func.func @transform_3(%arg0: i32, %arg1: i32, %arg2: i32) -> (i32, i32) {
    %c0_i32 = arith.constant 0 : i32
    return %arg0, %arg1 : i32, i32
  }
}

</mosaic_0001>

<bundles_post_ra>
// kernel: vit22bgan_forward.14
= control target key start
LH: loop header
LB: loop body
LE: loop exit
PB: predicated region body
PF: predicated region fallthrough
CT: control target
= control target key end

     0   :  { %vm18_vm0 = vcmask 261120   ;;  %v143_v2 = vmov 0.0   ;;  %vm39_vm1 = vcmask 523264   ;;  %s227_s1 = inlined_call_operand.vmem [shape: f32[64,32], index: 1, kind: input, shape index: {}]   ;;  %s228_s2 = inlined_call_operand.vmem [shape: f32[1,32], index: 2, kind: input, shape index: {}]   ;;  %s229_s0 = inlined_call_operand.vmem [shape: f32[32,64], index: 0, kind: input, shape index: {}]   ;;  %s230_s3 = inlined_call_operand.vmem [shape: f32[32,32], index: 3, kind: output, shape index: {}]  }
   0x1   :  { %v38_v0 = vld [vmem:[%s227_s1 + $0x38] sm:$0xff]  ;;  %v37_v1 = vld [vmem:[%s227_s1 + $0x30] sm:$0xff]  ;;  %19 = vst.msk [vmem:[#allocation2] sm:$0xff] %vm18_vm0, %v143_v2  ;;  %v36_v3 = vld [vmem:[%s227_s1 + $0x28] sm:$0xff] }
   0x2   :  { %118 = vmatpush.msra.mxu2 %v38_v0  ;;  %119 = vmatpush.msra.mxu3 %v38_v0  ;;  %20 = vst.msk [vmem:[#allocation2 + $0x8] sm:$0xff] %vm18_vm0, %v143_v2  ;;  %v35_v4 = vld [vmem:[%s227_s1 + $0x20] sm:$0xff]  ;;  %v34_v5 = vld [vmem:[%s227_s1 + $0x18] sm:$0xff]  ;;  %v33_v6 = vld [vmem:[%s227_s1 + $0x10] sm:$0xff] }
   0x3   :  { %60 = vmatpush.msra.mxu0 %v38_v0  ;;  %117 = vmatpush.msra.mxu1 %v38_v0  ;;  %21 = vst.msk [vmem:[#allocation2 + $0x10] sm:$0xff] %vm18_vm0, %v143_v2  ;;  %v32_v7 = vld [vmem:[%s227_s1 + $0x8] sm:$0xff]  ;;  %v31_v8 = vld [vmem:[%s227_s1] sm:$0xff]  ;;  %v29_v9 = vld [vmem:[%s229_s0 + $0x10] sm:$0xff] }
   0x4   :  { %121 = vmatpush.msra.mxu2 %v37_v1  ;;  %122 = vmatpush.msra.mxu3 %v37_v1  ;;  %22 = vst.msk [vmem:[#allocation2 + $0x18] sm:$0xff] %vm18_vm0, %v143_v2  ;;  %v30_v10 = vld [vmem:[%s229_s0 + $0x18] sm:$0xff]  ;;  %v27_v11 = vld [vmem:[%s229_s0] sm:$0xff]  ;;  %v28_v12 = vld [vmem:[%s229_s0 + $0x8] sm:$0xff] }
   0x5   :  { %61 = vmatpush.msra.mxu0 %v37_v1  ;;  %120 = vmatpush.msra.mxu1 %v37_v1  ;;  %v142_v25 = vld [vmem:[%s228_s2] ss:$0 sm:$0xff] }
   0x6   :  { %124 = vmatpush.msra.mxu2 %v36_v3  ;;  %125 = vmatpush.msra.mxu3 %v36_v3 }
   0x7   :  { %62 = vmatpush.msra.mxu0 %v36_v3  ;;  %123 = vmatpush.msra.mxu1 %v36_v3 }
   0x8   :  { %127 = vmatpush.msra.mxu2 %v35_v4  ;;  %128 = vmatpush.msra.mxu3 %v35_v4  ;;  %v23_v13 = vld [vmem:[#allocation2] sm:$0xff] }
   0x9   :  { %63 = vmatpush.msra.mxu0 %v35_v4  ;;  %126 = vmatpush.msra.mxu1 %v35_v4  ;;  %v24_v14 = vld [vmem:[#allocation2 + $0x8] sm:$0xff] }
   0xa   :  { %130 = vmatpush.msra.mxu2 %v34_v5  ;;  %131 = vmatpush.msra.mxu3 %v34_v5  ;;  %v25_v19 = vld [vmem:[#allocation2 + $0x10] sm:$0xff] }
   0xb   :  { %64 = vmatpush.msra.mxu0 %v34_v5  ;;  %129 = vmatpush.msra.mxu1 %v34_v5  ;;  %v26_v20 = vld [vmem:[#allocation2 + $0x18] sm:$0xff] }
   0xc   :  { %133 = vmatpush.msra.mxu2 %v33_v6  ;;  %134 = vmatpush.msra.mxu3 %v33_v6 }
   0xd   :  { %65 = vmatpush.msra.mxu0 %v33_v6  ;;  %132 = vmatpush.msra.mxu1 %v33_v6 }
   0xe   :  { %136 = vmatpush.msra.mxu2 %v32_v7  ;;  %137 = vmatpush.msra.mxu3 %v32_v7 }
   0xf   :  { %66 = vmatpush.msra.mxu0 %v32_v7  ;;  %135 = vmatpush.msra.mxu1 %v32_v7 }
  0x10   :  { %139 = vmatpush.msra.mxu2 %v31_v8  ;;  %140 = vmatpush.msra.mxu3 %v31_v8 }
  0x11   :  { %115 = vmatmul.msk.f32.vlgmr.msra.gmra.mxu2 %vm39_vm1, %v29_v9  ;;  %116 = vmatmul.msk.f32.vlgmr.msra.gmra.mxu3 %vm39_vm1, %v30_v10 }
  0x12   :  { %67 = vmatpush.msra.mxu0 %v31_v8  ;;  %138 = vmatpush.msra.mxu1 %v31_v8 }
  0x13   :  { %113 = vmatmul.msk.f32.vlgmr.msra.gmra.mxu0 %vm39_vm1, %v27_v11  ;;  %114 = vmatmul.msk.f32.vlgmr.msra.gmra.mxu1 %vm39_vm1, %v28_v12 }
  0x90   :  { %v69_v15 = vpop.f32.mrf.mxu0  ;;  %v72_v16 = vpop.f32.mrf.mxu1 }
  0x91   :  { %v81_v17 = vadd.f32 %v69_v15, %v23_v13  ;;  %v82_v18 = vadd.f32 %v72_v16, %v24_v14 }
  0x93   :  { %86 = vst.msk [vmem:[#allocation2] sm:$0xff] %vm18_vm0, %v81_v17 }
  0x94   :  { %87 = vst.msk [vmem:[#allocation2 + $0x8] sm:$0xff] %vm18_vm0, %v82_v18  ;;  %v75_v21 = vpop.f32.mrf.mxu2  ;;  %v78_v22 = vpop.f32.mrf.mxu3 }
  0x95   :  { %v83_v23 = vadd.f32 %v75_v21, %v25_v19  ;;  %v84_v24 = vadd.f32 %v78_v22, %v26_v20 }
  0x97   :  { %88 = vst.msk [vmem:[#allocation2 + $0x10] sm:$0xff] %vm18_vm0, %v83_v23 }
  0x98   :  { %89 = vst.msk [vmem:[#allocation2 + $0x18] sm:$0xff] %vm18_vm0, %v84_v24 }
  0x9a   :  { %v93_v26 = vld [vmem:[#allocation2] sm:$0xff] }
  0x9b   :  { %v101_v27 = vadd.f32 %v142_v25, %v93_v26  ;;  %v94_v28 = vld [vmem:[#allocation2 + $0x8] sm:$0xff] }
  0x9c   :  { %v102_v29 = vadd.f32 %v142_v25, %v94_v28 }
  0x9d   :  { %105 = vst.msk [vmem:[%s230_s3] sm:$0xff] %vm18_vm0, %v101_v27 }
  0x9e   :  { %106 = vst.msk [vmem:[%s230_s3 + $0x8] sm:$0xff] %vm18_vm0, %v102_v29  ;;  %v95_v30 = vld [vmem:[#allocation2 + $0x10] sm:$0xff] }
  0x9f   :  { %v103_v31 = vadd.f32 %v142_v25, %v95_v30  ;;  %v96_v32 = vld [vmem:[#allocation2 + $0x18] sm:$0xff] }
  0xa0   :  { %v104_v33 = vadd.f32 %v142_v25, %v96_v32 }
  0xa1   :  { %107 = vst.msk [vmem:[%s230_s3 + $0x10] sm:$0xff] %vm18_vm0, %v103_v31 }
  0xa2   :  { %108 = vst.msk [vmem:[%s230_s3 + $0x18] sm:$0xff] %vm18_vm0, %v104_v33 }

// kernel: vit22bgan_forward.15
= control target key start
LH: loop header
LB: loop body
LE: loop exit
PB: predicated region body
PF: predicated region fallthrough
CT: control target
= control target key end

     0   :  { %s452_s9 = smov 0   ;;  %s454_s10 = smov 0   ;;  %s504_s0 = inlined_call_operand.vmem [shape: f32[2,16,32], index: 0, kind: input, shape index: {}]   ;;  %s505_s1 = inlined_call_operand.vmem [shape: f32[1,16,32], index: 1, kind: input, shape index: {}]   ;;  %s506_s2 = inlined_call_operand.vmem [shape: f32[2,16,32], index: 2, kind: output, shape index: {}]  }
   0x1   :  { %s456_s11 = smov 0  }
   0x2 LB: > { %s24_s12 = sadd.s32 1, %s430_s10  ;;  %p372_p0 = scmp.ge.s32.totalorder %s434_s11, 1  ;;  %s434_s11 = sphi %s456_s11, %s12_s11   ;;  %s430_s10 = sphi %s454_s10, %s508_s10   ;;  %s426_s9 = sphi %s452_s9, %s507_s9  }
   0x3   : > { %p26_p1 = scmp.ge.s32.totalorder %s24_s12, 2  ;;  %p144_p2 = scmp.lt.s32.totalorder %s434_s11, 3 }
   0x5   : > { %s510_s12 = smov (%p26_p1, %s24_s12), 0  ;;  %p145_p3 = pnand %p372_p0, %p144_p2 }
   0x6   : > { %p180_p4 = scmp.lt.s32.totalorder (!%p145_p3), %s426_s9, 1 }
   0x7   : > { %148 = sbr.rel (%p145_p3) target bundleno = 291 (0x123), region = 28 }
   0xc   : > { %s512_s9 = smov (!%p180_p4, %s426_s9), 1  ;;  %vm207_vm0 = vcmask 261120   ;;  %v436_v4 = vmov 32.0   ;;  %v259_v35 = vld [vmem:[%s505_s1] sm:$0xff]  ;;  %v260_v43 = vld [vmem:[%s505_s1 + $0x8] sm:$0xff] }
   0xd   : > { %s379_s13 = sshll.u32 %s512_s9, 4  ;;  %406 = vrcp.f32 %v436_v4 }
   0xe   : > { %s187_s16 = scalar_lea.vmem %s504_s0, %s379_s13  ;;  %s203_s21 = scalar_lea.vmem %s506_s2, %s379_s13 }
   0xf   : > { %v205_v0 = vld [vmem:[%s187_s16] sm:$0xff]  ;;  %v206_v2 = vld [vmem:[%s187_s16 + $0x8] sm:$0xff] }
  0x10   : > { %v208_v1 = vsel %vm207_vm0, %v205_v0, 0.0  ;;  %v211_v3 = vsel %vm207_vm0, %v206_v2, 0.0 }
  0x11   : > { %209 = vadd.xlane.f32.xlu0 %v208_v1 }
  0x13   : > { %v407_v5 = vpop.eup %406 }
  0x14   : > { %v215_v6 = vmul.f32 32.0, %v407_v5  ;;  %vm219_vm1 = vweird.f32 %v407_v5 }
  0x16   : > { %v216_v7 = vsub.f32 1.0, %v215_v6 }
  0x18   : > { %v217_v8 = vmul.f32 %v407_v5, %v216_v7 }
  0x19   : > { %212 = vadd.xlane.f32.xlu0 %v211_v3 }
  0x1a   : > { %v218_v9 = vadd.f32 %v407_v5, %v217_v8 }
  0x1c   : > { %v220_v10 = vsel %vm219_vm1, %v407_v5, %v218_v9 }
  0x84   : > { %v210_v11 = vpop.xlane.xlu0 %209 }
  0x85   : > { %v221_v12 = vmul.f32 %v220_v10, %v210_v11 }
  0x87   : > { %v223_v13 = vsub.f32 %v205_v0, %v221_v12 }
  0x89   : > { %v225_v14 = vmul.f32 %v223_v13, %v223_v13 }
  0x8b   : > { %v227_v15 = vsel %vm207_vm0, %v225_v14, 0.0 }
  0x8c   : > { %228 = vadd.xlane.f32.xlu1 %v227_v15  ;;  %v213_v16 = vpop.xlane.xlu0 %212 }
  0x8d   : > { %v222_v17 = vmul.f32 %v220_v10, %v213_v16 }
  0x8f   : > { %v224_v18 = vsub.f32 %v206_v2, %v222_v17 }
  0x91   : > { %v226_v19 = vmul.f32 %v224_v18, %v224_v18 }
  0x93   : > { %v230_v20 = vsel %vm207_vm0, %v226_v19, 0.0 }
  0x94   : > { %231 = vadd.xlane.f32.xlu1 %v230_v20 }
  0xff   : > { %v229_v21 = vpop.xlane.xlu1 %228 }
 0x100   : > { %v233_v22 = vmul.f32 %v229_v21, %v220_v10 }
 0x102   : > { %v235_v23 = vadd.f32 1e-05, %v233_v22 }
 0x104   : > { %408 = vrsqrt.f32 %v235_v23  ;;  %vm243_vm3 = vweird.f32 %v235_v23 }
 0x107   : > { %v232_v24 = vpop.xlane.xlu1 %231 }
 0x108   : > { %v234_v25 = vmul.f32 %v232_v24, %v220_v10 }
 0x10a   : > { %v409_v26 = vpop.eup %408  ;;  %v236_v27 = vadd.f32 1e-05, %v234_v25 }
 0x10b   : > { %v238_v28 = vmul.f32 %v409_v26, %v235_v23  ;;  %vm244_vm2 = vweird.f32 %v409_v26 }
 0x10c   : > { %410 = vrsqrt.f32 %v236_v27  ;;  %vm245_vm4 = vmor %vm243_vm3, %vm244_vm2  ;;  %vm253_vm6 = vweird.f32 %v236_v27 }
 0x10d   : > { %v239_v29 = vmul.f32 %v409_v26, %v238_v28 }
 0x10f   : > { %v240_v30 = vmul.f32 0.5, %v239_v29 }
 0x111   : > { %v241_v31 = vsub.f32 1.5, %v240_v30 }
 0x112   : > { %v411_v32 = vpop.eup %410 }
 0x113   : > { %v242_v33 = vmul.f32 %v409_v26, %v241_v31  ;;  %v248_v34 = vmul.f32 %v411_v32, %v236_v27  ;;  %vm254_vm5 = vweird.f32 %v411_v32 }
 0x114   : > { %vm255_vm7 = vmor %vm253_vm6, %vm254_vm5 }
 0x115   : > { %v246_v36 = vsel %vm245_vm4, %v409_v26, %v242_v33  ;;  %v249_v37 = vmul.f32 %v411_v32, %v248_v34 }
 0x116   : > { %v257_v38 = vmul.f32 %v246_v36, %v223_v13 }
 0x117   : > { %v250_v39 = vmul.f32 0.5, %v249_v37 }
 0x118   : > { %v261_v40 = vadd.f32 %v259_v35, %v257_v38 }
 0x119   : > { %v251_v41 = vsub.f32 1.5, %v250_v39 }
 0x11a   : > { %263 = vst.msk [vmem:[%s203_s21] sm:$0xff] %vm207_vm0, %v261_v40 }
 0x11b   : > { %v252_v42 = vmul.f32 %v411_v32, %v251_v41 }
 0x11d   : > { %v256_v44 = vsel %vm255_vm7, %v411_v32, %v252_v42 }
 0x11e   : > { %v258_v45 = vmul.f32 %v256_v44, %v224_v18 }
 0x120   : > { %v262_v46 = vadd.f32 %v260_v43, %v258_v45 }
 0x122   : > { %264 = vst.msk [vmem:[%s203_s21 + $0x8] sm:$0xff] %vm207_vm0, %v262_v46 }
 0x123 PF: > { %s12_s11 = sadd.s32 1, %s434_s11   ;;  %s507_s9 = smov %s430_s10 }
 0x124   : > { %p9_p5 = scmp.ge.s32.totalorder %s12_s11, 4   ;;  %s508_s10 = smov %s510_s12 }
 0x126   :  { %11 = sbr.rel (!%p9_p5) target bundleno = 2 (0x2), region = 61 }

// kernel: vit22bgan_forward.16
= control target key start
LH: loop header
LB: loop body
LE: loop exit
PB: predicated region body
PF: predicated region fallthrough
CT: control target
= control target key end

     0   :  { %vm18_vm0 = vcmask 785408   ;;  %v127_v2 = vmov 0.0   ;;  %vm35_vm1 = vcmask 261120   ;;  %s199_s1 = inlined_call_operand.vmem [shape: f32[32,96], index: 1, kind: input, shape index: {}]   ;;  %s200_s2 = inlined_call_operand.vmem [shape: f32[1,96], index: 2, kind: input, shape index: {}]   ;;  %s201_s0 = inlined_call_operand.vmem [shape: f32[32,32], index: 0, kind: input, shape index: {}]   ;;  %s202_s3 = inlined_call_operand.vmem [shape: f32[32,96], index: 3, kind: output, shape index: {}]  }
   0x1   :  { %v34_v0 = vld [vmem:[%s199_s1 + $0x18] sm:$0xff]  ;;  %v33_v1 = vld [vmem:[%s199_s1 + $0x10] sm:$0xff]  ;;  %19 = vst.msk [vmem:[#allocation2] sm:$0xff] %vm18_vm0, %v127_v2  ;;  %v32_v3 = vld [vmem:[%s199_s1 + $0x8] sm:$0xff] }
   0x2   :  { %114 = vmatpush.msra.mxu2 %v34_v0  ;;  %115 = vmatpush.msra.mxu3 %v34_v0  ;;  %20 = vst.msk [vmem:[#allocation2 + $0x8] sm:$0xff] %vm18_vm0, %v127_v2  ;;  %v31_v4 = vld [vmem:[%s199_s1] sm:$0xff]  ;;  %v29_v5 = vld [vmem:[%s201_s0 + $0x10] sm:$0xff]  ;;  %v30_v6 = vld [vmem:[%s201_s0 + $0x18] sm:$0xff] }
   0x3   :  { %60 = vmatpush.msra.mxu0 %v34_v0  ;;  %113 = vmatpush.msra.mxu1 %v34_v0  ;;  %21 = vst.msk [vmem:[#allocation2 + $0x10] sm:$0xff] %vm18_vm0, %v127_v2  ;;  %v27_v7 = vld [vmem:[%s201_s0] sm:$0xff]  ;;  %v28_v8 = vld [vmem:[%s201_s0 + $0x8] sm:$0xff] }
   0x4   :  { %117 = vmatpush.msra.mxu2 %v33_v1  ;;  %118 = vmatpush.msra.mxu3 %v33_v1  ;;  %22 = vst.msk [vmem:[#allocation2 + $0x18] sm:$0xff] %vm18_vm0, %v127_v2  ;;  %v126_v21 = vld [vmem:[%s200_s2] ss:$0 sm:$0xff] }
   0x5   :  { %61 = vmatpush.msra.mxu0 %v33_v1  ;;  %116 = vmatpush.msra.mxu1 %v33_v1 }
   0x6   :  { %120 = vmatpush.msra.mxu2 %v32_v3  ;;  %121 = vmatpush.msra.mxu3 %v32_v3 }
   0x7   :  { %62 = vmatpush.msra.mxu0 %v32_v3  ;;  %119 = vmatpush.msra.mxu1 %v32_v3 }
   0x8   :  { %123 = vmatpush.msra.mxu2 %v31_v4  ;;  %124 = vmatpush.msra.mxu3 %v31_v4  ;;  %v23_v9 = vld [vmem:[#allocation2] sm:$0xff] }
   0x9   :  { %111 = vmatmul.msk.f32.vlgmr.msra.gmra.mxu2 %vm35_vm1, %v29_v5  ;;  %112 = vmatmul.msk.f32.vlgmr.msra.gmra.mxu3 %vm35_vm1, %v30_v6  ;;  %v24_v10 = vld [vmem:[#allocation2 + $0x8] sm:$0xff] }
   0xa   :  { %63 = vmatpush.msra.mxu0 %v31_v4  ;;  %122 = vmatpush.msra.mxu1 %v31_v4  ;;  %v25_v15 = vld [vmem:[#allocation2 + $0x10] sm:$0xff] }
   0xb   :  { %109 = vmatmul.msk.f32.vlgmr.msra.gmra.mxu0 %vm35_vm1, %v27_v7  ;;  %110 = vmatmul.msk.f32.vlgmr.msra.gmra.mxu1 %vm35_vm1, %v28_v8  ;;  %v26_v16 = vld [vmem:[#allocation2 + $0x18] sm:$0xff] }
  0x88   :  { %v65_v11 = vpop.f32.mrf.mxu0  ;;  %v68_v12 = vpop.f32.mrf.mxu1 }
  0x89   :  { %v77_v13 = vadd.f32 %v65_v11, %v23_v9  ;;  %v78_v14 = vadd.f32 %v68_v12, %v24_v10 }
  0x8b   :  { %82 = vst.msk [vmem:[#allocation2] sm:$0xff] %vm18_vm0, %v77_v13 }
  0x8c   :  { %83 = vst.msk [vmem:[#allocation2 + $0x8] sm:$0xff] %vm18_vm0, %v78_v14  ;;  %v71_v17 = vpop.f32.mrf.mxu2  ;;  %v74_v18 = vpop.f32.mrf.mxu3 }
  0x8d   :  { %v79_v19 = vadd.f32 %v71_v17, %v25_v15  ;;  %v80_v20 = vadd.f32 %v74_v18, %v26_v16 }
  0x8f   :  { %84 = vst.msk [vmem:[#allocation2 + $0x10] sm:$0xff] %vm18_vm0, %v79_v19 }
  0x90   :  { %85 = vst.msk [vmem:[#allocation2 + $0x18] sm:$0xff] %vm18_vm0, %v80_v20 }
  0x92   :  { %v89_v22 = vld [vmem:[#allocation2] sm:$0xff] }
  0x93   :  { %v97_v23 = vadd.f32 %v126_v21, %v89_v22  ;;  %v90_v24 = vld [vmem:[#allocation2 + $0x8] sm:$0xff] }
  0x94   :  { %v98_v25 = vadd.f32 %v126_v21, %v90_v24 }
  0x95   :  { %101 = vst.msk [vmem:[%s202_s3] sm:$0xff] %vm18_vm0, %v97_v23 }
  0x96   :  { %102 = vst.msk [vmem:[%s202_s3 + $0x8] sm:$0xff] %vm18_vm0, %v98_v25  ;;  %v91_v26 = vld [vmem:[#allocation2 + $0x10] sm:$0xff] }
  0x97   :  { %v99_v27 = vadd.f32 %v126_v21, %v91_v26  ;;  %v92_v28 = vld [vmem:[#allocation2 + $0x18] sm:$0xff] }
  0x98   :  { %v100_v29 = vadd.f32 %v126_v21, %v92_v28 }
  0x99   :  { %103 = vst.msk [vmem:[%s202_s3 + $0x10] sm:$0xff] %vm18_vm0, %v99_v27 }
  0x9a   :  { %104 = vst.msk [vmem:[%s202_s3 + $0x18] sm:$0xff] %vm18_vm0, %v100_v29 }

// kernel: vit22bgan_forward.17
= control target key start
LH: loop header
LB: loop body
LE: loop exit
PB: predicated region body
PF: predicated region fallthrough
CT: control target
= control target key end

     0   :  { %s842_s12 = smov 0   ;;  %s844_s13 = smov 0   ;;  %s936_s0 = inlined_call_operand.vmem [shape: f32[8,16,8], index: 0, kind: input, shape index: {}]   ;;  %s937_s1 = inlined_call_operand.vmem [shape: f32[8,16,8], index: 1, kind: input, shape index: {}]   ;;  %s938_s2 = inlined_call_operand.vmem [shape: f32[8,16,8], index: 2, kind: input, shape index: {}]   ;;  %s939_s3 = inlined_call_operand.vmem [shape: f32[8,16,8], index: 3, kind: output, shape index: {}]  }
   0x1   :  { %s846_s14 = smov 0  }
   0x2 LB: > { %s32_s15 = sadd.s32 1, %s812_s13  ;;  %p716_p0 = scmp.ge.s32.totalorder %s816_s14, 1  ;;  %s816_s14 = sphi %s846_s14, %s13_s14   ;;  %s812_s13 = sphi %s844_s13, %s941_s13   ;;  %s808_s12 = sphi %s842_s12, %s940_s12  }
   0x3   : > { %p34_p1 = scmp.ge.s32.totalorder %s32_s15, 8  ;;  %p199_p2 = scmp.lt.s32.totalorder %s816_s14, 9 }
   0x5   : > { %s943_s15 = smov (%p34_p1, %s32_s15), 0  ;;  %p200_p3 = pnand %p716_p0, %p199_p2 }
   0x6   : > { %p250_p4 = scmp.lt.s32.totalorder (!%p200_p3), %s808_s12, 7 }
   0x7   : > { %203 = sbr.rel (%p200_p3) target bundleno = 906 (0x38a), region = 32 }
   0xc   : > { %s945_s12 = smov (!%p250_p4, %s808_s12), 7  ;;  %vm298_vm0 = vcmask 64512   ;;  %v818_v8 = vmov 8.0   ;;  %vm293_vm14 = vcmask 7168   ;;  %vm440_vm15 = vcmask 130048  }
   0xd   : > { %s860_s16 = sshll.u32 %s945_s12, 4  ;;  %772 = vrcp.f32 %v818_v8 }
   0xe   : > { %s267_s19 = scalar_lea.vmem %s937_s1, %s860_s16  ;;  %s257_s22 = scalar_lea.vmem %s936_s0, %s860_s16 }
   0xf   : > { %v358_v0 = vld [vmem:[%s267_s19 + $0x8] sm:$0xff]  ;;  %v357_v4 = vld [vmem:[%s267_s19] sm:$0xff]  ;;  %s277_s25 = scalar_lea.vmem %s938_s2, %s860_s16  ;;  %s287_s28 = scalar_lea.vmem %s939_s3, %s860_s16 }
  0x10   : > { %v302_v1 = vld [vmem:[%s257_s22 + $0x8] sm:$0xff]  ;;  %v362_v2 = vsel %vm298_vm0, %v358_v0, 0.0  ;;  %v301_v5 = vld [vmem:[%s257_s22] sm:$0xff]  ;;  %v359_v6 = vsel %vm298_vm0, %v357_v4, 0.0 }
  0x11   : > { %v307_v3 = vsel %vm298_vm0, %v302_v1, 0.0  ;;  %363 = vadd.xlane.f32.xlu0 %v362_v2  ;;  %v304_v7 = vsel %vm298_vm0, %v301_v5, 0.0 }
  0x12   : > { %308 = vadd.xlane.f32.xlu1 %v307_v3 }
  0x13   : > { %v773_v9 = vpop.eup %772 }
  0x14   : > { %v311_v10 = vmul.f32 8.0, %v773_v9  ;;  %vm315_vm1 = vweird.f32 %v773_v9 }
  0x16   : > { %v312_v11 = vsub.f32 1.0, %v311_v10 }
  0x18   : > { %v313_v12 = vmul.f32 %v773_v9, %v312_v11 }
  0x19   : > { %360 = vadd.xlane.f32.xlu0 %v359_v6 }
  0x1a   : > { %305 = vadd.xlane.f32.xlu1 %v304_v7  ;;  %v314_v13 = vadd.f32 %v773_v9, %v313_v12 }
  0x1c   : > { %v316_v14 = vsel %vm315_vm1, %v773_v9, %v314_v13 }
  0x84   : > { %v364_v15 = vpop.xlane.xlu0 %363 }
  0x85   : > { %v309_v16 = vpop.xlane.xlu1 %308  ;;  %v366_v17 = vmul.f32 %v364_v15, %v316_v14 }
  0x86   : > { %v318_v18 = vmul.f32 %v316_v14, %v309_v16 }
  0x87   : > { %v368_v19 = vsub.f32 %v358_v0, %v366_v17  ;;  %v819_v17 = vmov -inf  }
  0x88   : > { %v874_v20 = vsub.f32 %v302_v1, %v318_v18  ;;  %294 = vst.msk [vmem:[#allocation2] sm:$0xff] %vm293_vm14, %v819_v17 }
  0x89   : > { %v370_v21 = vmul.f32 %v368_v19, %v368_v19  ;;  %295 = vst.msk [vmem:[#allocation2 + $0x8] sm:$0xff] %vm293_vm14, %v819_v17 }
  0x8a   : > { %v322_v22 = vmul.f32 %v874_v20, %v874_v20 }
  0x8b   : > { %v374_v23 = vsel %vm298_vm0, %v370_v21, 0.0 }
  0x8c   : > { %v326_v24 = vsel %vm298_vm0, %v322_v22, 0.0  ;;  %375 = vadd.xlane.f32.xlu2 %v374_v23  ;;  %v361_v25 = vpop.xlane.xlu0 %360  ;;  %v820_v22 = vmov 0   ;;  %v821_v23 = vmov 0.0  }
  0x8d   : > { %327 = vadd.xlane.f32.xlu0 %v326_v24  ;;  %v306_v26 = vpop.xlane.xlu1 %305  ;;  %v365_v27 = vmul.f32 %v361_v25, %v316_v14  ;;  %770 = vset.pattern.permute.xlu2 %v820_v22  ;;  %300 = vst.msk [vmem:[#allocation4 + $0x8] sm:$0xff] %vm298_vm0, %v821_v23 }
  0x8e   : > { %v317_v28 = vmul.f32 %v316_v14, %v306_v26  ;;  %769 = vset.pattern.permute.xlu1 %v820_v22  ;;  %771 = vset.pattern.permute.xlu0 %v820_v22  ;;  %296 = vst.msk [vmem:[#allocation3] sm:$0xff] %vm293_vm14, %v821_v23 }
  0x8f   : > { %v880_v29 = vsub.f32 %v357_v4, %v365_v27  ;;  %297 = vst.msk [vmem:[#allocation3 + $0x8] sm:$0xff] %vm293_vm14, %v821_v23  ;;  %v438_v24 = vld [vmem:[#allocation2] sm:$0xff] }
  0x90   : > { %v882_v30 = vsub.f32 %v301_v5, %v317_v28  ;;  %299 = vst.msk [vmem:[#allocation4] sm:$0xff] %vm298_vm0, %v821_v23  ;;  %v439_v28 = vld [vmem:[#allocation2 + $0x8] sm:$0xff] }
  0x91   : > { %v369_v31 = vmul.f32 %v880_v29, %v880_v29 }
  0x92   : > { %v321_v32 = vmul.f32 %v882_v30, %v882_v30 }
  0x93   : > { %v371_v33 = vsel %vm298_vm0, %v369_v31, 0.0 }
  0x94   : > { %v323_v34 = vsel %vm298_vm0, %v321_v32, 0.0  ;;  %372 = vadd.xlane.f32.xlu2 %v371_v33 }
  0x95   : > { %324 = vadd.xlane.f32.xlu1 %v323_v34  ;;  %v501_v34 = vld [vmem:[%s277_s25 + $0x8] sm:$0xff] }
  0x96   : > { %522 = vmatpush.msra.mxu1 %v501_v34  ;;  %739 = vmatpush.msra.mxu3 %v501_v34 }
  0xff   : > { %v376_v35 = vpop.xlane.xlu2 %375 }
 0x100   : > { %v328_v36 = vpop.xlane.xlu0 %327  ;;  %v378_v37 = vmul.f32 %v376_v35, %v316_v14  ;;  %v500_v35 = vld [vmem:[%s277_s25] sm:$0xff] }
 0x101   : > { %v330_v38 = vmul.f32 %v328_v36, %v316_v14  ;;  %523 = vmatpush.msra.mxu1 %v500_v35  ;;  %740 = vmatpush.msra.mxu3 %v500_v35 }
 0x102   : > { %v380_v39 = vadd.f32 1e-05, %v378_v37 }
 0x103   : > { %v332_v40 = vadd.f32 1e-05, %v330_v38 }
 0x104   : > { %774 = vrsqrt.f32 %v380_v39  ;;  %vm397_vm3 = vweird.f32 %v380_v39 }
 0x105   : > { %776 = vrsqrt.f32 %v332_v40  ;;  %vm349_vm5 = vweird.f32 %v332_v40 }
 0x107   : > { %v373_v41 = vpop.xlane.xlu2 %372 }
 0x108   : > { %v325_v42 = vpop.xlane.xlu1 %324  ;;  %v377_v43 = vmul.f32 %v373_v41, %v316_v14 }
 0x109   : > { %v329_v44 = vmul.f32 %v325_v42, %v316_v14 }
 0x10a   : > { %v775_v45 = vpop.eup %774  ;;  %v379_v46 = vadd.f32 1e-05, %v377_v43 }
 0x10b   : > { %v331_v47 = vadd.f32 1e-05, %v329_v44  ;;  %v777_v48 = vpop.eup %776  ;;  %v392_v49 = vmul.f32 %v775_v45, %v380_v39  ;;  %vm398_vm2 = vweird.f32 %v775_v45 }
 0x10c   : > { %v344_v50 = vmul.f32 %v777_v48, %v332_v40  ;;  %778 = vrsqrt.f32 %v379_v46  ;;  %vm399_vm4 = vmor %vm397_vm3, %vm398_vm2  ;;  %vm350_vm6 = vweird.f32 %v777_v48  ;;  %vm387_vm11 = vweird.f32 %v379_v46 }
 0x10d   : > { %v393_v51 = vmul.f32 %v775_v45, %v392_v49  ;;  %780 = vrsqrt.f32 %v331_v47  ;;  %vm351_vm7 = vmor %vm349_vm5, %vm350_vm6  ;;  %vm339_vm9 = vweird.f32 %v331_v47 }
 0x10e   : > { %v345_v52 = vmul.f32 %v777_v48, %v344_v50 }
 0x10f   : > { %v394_v53 = vmul.f32 0.5, %v393_v51 }
 0x110   : > { %v346_v54 = vmul.f32 0.5, %v345_v52 }
 0x111   : > { %v395_v55 = vsub.f32 1.5, %v394_v53 }
 0x112   : > { %v779_v56 = vpop.eup %778  ;;  %v347_v57 = vsub.f32 1.5, %v346_v54 }
 0x113   : > { %v781_v58 = vpop.eup %780  ;;  %v382_v59 = vmul.f32 %v779_v56, %v379_v46  ;;  %v396_v60 = vmul.f32 %v775_v45, %v395_v55  ;;  %vm388_vm8 = vweird.f32 %v779_v56 }
 0x114   : > { %v334_v61 = vmul.f32 %v781_v58, %v331_v47  ;;  %v348_v2 = vmul.f32 %v777_v48, %v347_v57  ;;  %vm340_vm10 = vweird.f32 %v781_v58  ;;  %vm389_vm12 = vmor %vm387_vm11, %vm388_vm8 }
 0x115   : > { %v383_v62 = vmul.f32 %v779_v56, %v382_v59  ;;  %v400_v63 = vsel %vm399_vm4, %v775_v45, %v396_v60  ;;  %vm341_vm13 = vmor %vm339_vm9, %vm340_vm10 }
 0x116   : > { %v335_v0 = vmul.f32 %v781_v58, %v334_v61  ;;  %v402_v1 = vmul.f32 %v400_v63, %v368_v19  ;;  %v352_v7 = vsel %vm351_vm7, %v777_v48, %v348_v2  ;;  %v471_v48 = vld [vmem:[#allocation3] sm:$0xff] }
 0x117   : > { %v384_v3 = vmul.f32 0.5, %v383_v62  ;;  %v354_v11 = vmul.f32 %v352_v7, %v874_v20  ;;  %v472_v62 = vld [vmem:[#allocation3 + $0x8] sm:$0xff] }
 0x118   : > { %v336_v4 = vmul.f32 0.5, %v335_v0  ;;  %725 = vmatpush.xpose.msk.msra.mxu0 %vm298_vm0, %v402_v1  ;;  %737 = vmatpush.xpose.msk.msra.mxu2 %vm298_vm0, %v402_v1 }
 0x119   : > { %v385_v5 = vsub.f32 1.5, %v384_v3  ;;  %v356_v16 = vmul.f32 0.17677669, %v354_v11 }
 0x11a   : > { %v337_v6 = vsub.f32 1.5, %v336_v4  ;;  %v487_v4 = vld [vmem:[#allocation4 + $0x8] sm:$0xff] }
 0x11b   : > { %v386_v8 = vmul.f32 %v779_v56, %v385_v5 }
 0x11c   : > { %v338_v9 = vmul.f32 %v781_v58, %v337_v6 }
 0x11d   : > { %v390_v10 = vsel %vm389_vm12, %v779_v56, %v386_v8 }
 0x11e   : > { %v401_v12 = vmul.f32 %v390_v10, %v880_v29  ;;  %v342_v13 = vsel %vm341_vm13, %v781_v58, %v338_v9  ;;  %v486_v10 = vld [vmem:[#allocation4] sm:$0xff] }
 0x11f   : > { %v353_v14 = vmul.f32 %v342_v13, %v882_v30 }
 0x120   : > { %726 = vmatpush.xpose.msk.msra.mxu0 %vm298_vm0, %v401_v12  ;;  %738 = vmatpush.xpose.msk.msra.mxu2 %vm298_vm0, %v401_v12 }
 0x121   : > { %v355_v15 = vmul.f32 0.17677669, %v353_v14 }
 0x123   : > { %727 = vmatmul.msk.f32.vlgmr.msra.gmra.mxu0 %vm298_vm0, %v355_v15  ;;  %728 = vmatmul.msk.f32.vlgmr.msra.gmra.mxu2 %vm298_vm0, %v356_v16 }
 0x1a0   : > { %v432_v18 = vpop.f32.mrf.mxu0 }
 0x1a1   : > { %v441_v19 = vsel %vm440_vm15, %v432_v18, -inf }
 0x1a2   : > { %442 = vmax.xlane.f32.xlu0 %v441_v19 }
 0x1a6   : > { %v435_v20 = vpop.f32.mrf.mxu2 }
 0x1a7   : > { %v444_v21 = vsel %vm440_vm15, %v435_v20, -inf }
 0x1a8   : > { %445 = vmax.xlane.f32.xlu2 %v444_v21 }
 0x215   : > { %v443_v25 = vpop.xlane.xlu0 %442 }
 0x216   : > { %v447_v26 = vmax.f32 %v438_v24, %v443_v25 }
 0x218   : > { %v449_v27 = vsub.f32 %v438_v24, %v447_v26  ;;  %535 = vst.msk [vmem:[#allocation2] sm:$0xff] %vm293_vm14, %v447_v26  ;;  %457 = vperm.xlu2 %770, %v447_v26  }
 0x21a   : > { %v451_v46 = vmul.f32 1.442695, %v449_v27 }
 0x21b   : > { %v446_v29 = vpop.xlane.xlu2 %445 }
 0x21c   : > { %v448_v30 = vmax.f32 %v439_v28, %v446_v29 }
 0x21e   : > { %v450_v31 = vsub.f32 %v439_v28, %v448_v30  ;;  %536 = vst.msk [vmem:[#allocation2 + $0x8] sm:$0xff] %vm293_vm14, %v448_v30  ;;  %462 = vperm.xlu1 %769, %v448_v30  }
 0x220   : > { %v453_v32 = vmul.f32 1.442695, %v450_v31 }
 0x222   : > { %782 = vpow2.f32 %v453_v32 }
 0x228   : > { %v783_v33 = vpop.eup %782 }
 0x229   : > { %495 = vperm.xlu2 %770, %v783_v33   ;;  %v474_v0 = vmul.f32 %v783_v33, %v472_v62 }
 0x272   : > { %v458_v36 = vpop.permute.xlu2 %457 }
 0x273   : > { %v465_v37 = vsub.f32 %v432_v18, %v458_v36 }
 0x275   : > { %v467_v38 = vmul.f32 1.442695, %v465_v37 }
 0x277   : > { %784 = vpow2.f32 %v467_v38 }
 0x27d   : > { %v785_v39 = vpop.eup %784 }
 0x27e   : > { %729 = vmatmul.msk.f32.vlgmr.msra.gmra.mxu1 %vm440_vm15, %v785_v39  ;;  %v475_v40 = vsel %vm440_vm15, %v785_v39, 0.0 }
 0x27f   : > { %476 = vadd.xlane.f32.xlu0 %v475_v40 }
 0x283   : > { %v496_v5 = vpop.permute.xlu2 %495 }
 0x284   : > { %v499_v6 = vmul.f32 %v496_v5, %v487_v4 }
 0x290   : > { %v463_v41 = vpop.permute.xlu1 %462 }
 0x291   : > { %v466_v42 = vsub.f32 %v435_v20, %v463_v41 }
 0x293   : > { %v469_v43 = vmul.f32 1.442695, %v466_v42 }
 0x295   : > { %786 = vpow2.f32 %v469_v43 }
 0x296   : > { %788 = vpow2.f32 %v451_v46 }
 0x29b   : > { %v787_v44 = vpop.eup %786 }
 0x29c   : > { %730 = vmatmul.msk.f32.vlgmr.msra.gmra.mxu3 %vm440_vm15, %v787_v44  ;;  %v478_v45 = vsel %vm440_vm15, %v787_v44, 0.0  ;;  %v789_v47 = vpop.eup %788 }
 0x29d   : > { %479 = vadd.xlane.f32.xlu0 %v478_v45  ;;  %v473_v49 = vmul.f32 %v789_v47, %v471_v48 }
 0x2b1   : > { %490 = vperm.xlu0 %771, %v789_v47  }
 0x2f2   : > { %v477_v50 = vpop.xlane.xlu0 %476 }
 0x2f3   : > { %v481_v51 = vadd.f32 %v477_v50, %v473_v49 }
 0x2f5   : > { %484 = vst.msk [vmem:[#allocation3] sm:$0xff] %vm293_vm14, %v481_v51 }
 0x2fb   : > { %v525_v15 = vpop.f32.mrf.mxu1 }
 0x2fc   : > { %v540_v52 = vld [vmem:[#allocation3] sm:$0xff] }
 0x2fd   : > { %790 = vrcp.f32 %v540_v52  ;;  %v553_v56 = vand.u32 2147483648, %v540_v52  ;;  %v551_v58 = vand.u32 2147483647, %v540_v52  ;;  %vm547_vm2 = vweird.f32 %v540_v52 }
 0x2ff   : > { %v554_v60 = vor.u32 1.1754944e-38, %v553_v56  ;;  %vm552_vm4 = vcmp.eq.f32.partialorder %v551_v58, 8.507059e+37 }
 0x303   : > { %v791_v53 = vpop.eup %790 }
 0x304   : > { %v543_v54 = vmul.f32 %v791_v53, %v540_v52  ;;  %vm548_vm1 = vweird.f32 %v791_v53 }
 0x305   : > { %vm549_vm3 = vmor %vm547_vm2, %vm548_vm1 }
 0x306   : > { %v544_v55 = vsub.f32 1.0, %v543_v54 }
 0x308   : > { %v545_v57 = vmul.f32 %v791_v53, %v544_v55 }
 0x30a   : > { %v546_v59 = vadd.f32 %v791_v53, %v545_v57 }
 0x30c   : > { %v550_v61 = vsel %vm549_vm3, %v791_v53, %v546_v59 }
 0x30d   : > { %v555_v63 = vsel %vm552_vm4, %v554_v60, %v550_v61 }
 0x30e   : > { %574 = vperm.xlu1 %769, %v555_v63  }
 0x310   : > { %v480_v1 = vpop.xlane.xlu0 %479 }
 0x311   : > { %v482_v2 = vadd.f32 %v480_v1, %v474_v0 }
 0x313   : > { %485 = vst.msk [vmem:[#allocation3 + $0x8] sm:$0xff] %vm293_vm14, %v482_v2 }
 0x31a   : > { %v541_v3 = vld [vmem:[#allocation3 + $0x8] sm:$0xff] }
 0x31b   : > { %792 = vrcp.f32 %v541_v3  ;;  %v567_v16 = vand.u32 2147483648, %v541_v3  ;;  %v565_v19 = vand.u32 2147483647, %v541_v3  ;;  %vm561_vm6 = vweird.f32 %v541_v3 }
 0x31d   : > { %v568_v21 = vor.u32 1.1754944e-38, %v567_v16  ;;  %vm566_vm8 = vcmp.eq.f32.partialorder %v565_v19, 8.507059e+37 }
 0x31f   : > { %v528_v7 = vpop.f32.mrf.mxu3 }
 0x320   : > { %v532_v8 = vadd.f32 %v528_v7, %v499_v6 }
 0x321   : > { %v793_v9 = vpop.eup %792 }
 0x322   : > { %534 = vst.msk [vmem:[#allocation4 + $0x8] sm:$0xff] %vm298_vm0, %v532_v8  ;;  %v557_v11 = vmul.f32 %v793_v9, %v541_v3  ;;  %vm562_vm5 = vweird.f32 %v793_v9 }
 0x323   : > { %v491_v12 = vpop.permute.xlu0 %490  ;;  %vm563_vm7 = vmor %vm561_vm6, %vm562_vm5 }
 0x324   : > { %v498_v13 = vmul.f32 %v491_v12, %v486_v10  ;;  %v558_v14 = vsub.f32 1.0, %v557_v11 }
 0x326   : > { %v531_v17 = vadd.f32 %v525_v15, %v498_v13  ;;  %v559_v18 = vmul.f32 %v793_v9, %v558_v14 }
 0x328   : > { %533 = vst.msk [vmem:[#allocation4] sm:$0xff] %vm298_vm0, %v531_v17  ;;  %v560_v20 = vadd.f32 %v793_v9, %v559_v18 }
 0x329   : > { %v571_v27 = vld [vmem:[#allocation4 + $0x8] sm:$0xff] }
 0x32a   : > { %v564_v22 = vsel %vm563_vm7, %v793_v9, %v560_v20 }
 0x32b   : > { %v569_v23 = vsel %vm566_vm8, %v568_v21, %v564_v22 }
 0x32c   : > { %579 = vperm.xlu2 %770, %v569_v23  }
 0x32f   : > { %v570_v24 = vld [vmem:[#allocation4] sm:$0xff] }
 0x380   : > { %v575_v25 = vpop.permute.xlu1 %574 }
 0x381   : > { %v582_v26 = vmul.f32 %v575_v25, %v570_v24 }
 0x383   : > { %584 = vst.msk [vmem:[%s287_s28] sm:$0xff] %vm298_vm0, %v582_v26 }
 0x386   : > { %v580_v28 = vpop.permute.xlu2 %579 }
 0x387   : > { %v583_v29 = vmul.f32 %v580_v28, %v571_v27 }
 0x389   : > { %585 = vst.msk [vmem:[%s287_s28 + $0x8] sm:$0xff] %vm298_vm0, %v583_v29 }
 0x38a PF: > { %s13_s14 = sadd.s32 1, %s816_s14   ;;  %s940_s12 = smov %s812_s13 }
 0x38b   : > { %p10_p5 = scmp.ge.s32.totalorder %s13_s14, 10   ;;  %s941_s13 = smov %s943_s15 }
 0x38d   :  { %12 = sbr.rel (!%p10_p5) target bundleno = 2 (0x2), region = 76 }

// kernel: vit22bgan_forward.27
= control target key start
LH: loop header
LB: loop body
LE: loop exit
PB: predicated region body
PF: predicated region fallthrough
CT: control target
= control target key end

     0   :  { %vm18_vm0 = vcmask 523264   ;;  %v154_v2 = vmov 0.0   ;;  %s242_s1 = inlined_call_operand.vmem [shape: f32[64,64], index: 1, kind: input, shape index: {}]   ;;  %s243_s2 = inlined_call_operand.vmem [shape: f32[1,64], index: 2, kind: input, shape index: {}]   ;;  %s244_s0 = inlined_call_operand.vmem [shape: f32[32,64], index: 0, kind: input, shape index: {}]   ;;  %s245_s3 = inlined_call_operand.vmem [shape: f32[32,64], index: 3, kind: output, shape index: {}]  }
   0x1   :  { %v38_v0 = vld [vmem:[%s242_s1 + $0x38] sm:$0xff]  ;;  %v37_v1 = vld [vmem:[%s242_s1 + $0x30] sm:$0xff]  ;;  %19 = vst.msk [vmem:[#allocation2] sm:$0xff] %vm18_vm0, %v154_v2  ;;  %v36_v3 = vld [vmem:[%s242_s1 + $0x28] sm:$0xff] }
   0x2   :  { %121 = vmatpush.msra.mxu2 %v38_v0  ;;  %122 = vmatpush.msra.mxu3 %v38_v0  ;;  %20 = vst.msk [vmem:[#allocation2 + $0x8] sm:$0xff] %vm18_vm0, %v154_v2  ;;  %v35_v4 = vld [vmem:[%s242_s1 + $0x20] sm:$0xff]  ;;  %v34_v5 = vld [vmem:[%s242_s1 + $0x18] sm:$0xff]  ;;  %v33_v6 = vld [vmem:[%s242_s1 + $0x10] sm:$0xff] }
   0x3   :  { %60 = vmatpush.msra.mxu0 %v38_v0  ;;  %120 = vmatpush.msra.mxu1 %v38_v0  ;;  %21 = vst.msk [vmem:[#allocation2 + $0x10] sm:$0xff] %vm18_vm0, %v154_v2  ;;  %v32_v7 = vld [vmem:[%s242_s1 + $0x8] sm:$0xff]  ;;  %v31_v8 = vld [vmem:[%s242_s1] sm:$0xff]  ;;  %v29_v9 = vld [vmem:[%s244_s0 + $0x10] sm:$0xff] }
   0x4   :  { %124 = vmatpush.msra.mxu2 %v37_v1  ;;  %125 = vmatpush.msra.mxu3 %v37_v1  ;;  %22 = vst.msk [vmem:[#allocation2 + $0x18] sm:$0xff] %vm18_vm0, %v154_v2  ;;  %v30_v10 = vld [vmem:[%s244_s0 + $0x18] sm:$0xff]  ;;  %v27_v11 = vld [vmem:[%s244_s0] sm:$0xff]  ;;  %v28_v12 = vld [vmem:[%s244_s0 + $0x8] sm:$0xff] }
   0x5   :  { %61 = vmatpush.msra.mxu0 %v37_v1  ;;  %123 = vmatpush.msra.mxu1 %v37_v1  ;;  %v145_v25 = vld [vmem:[%s243_s2] ss:$0 sm:$0xff] }
   0x6   :  { %127 = vmatpush.msra.mxu2 %v36_v3  ;;  %128 = vmatpush.msra.mxu3 %v36_v3 }
   0x7   :  { %62 = vmatpush.msra.mxu0 %v36_v3  ;;  %126 = vmatpush.msra.mxu1 %v36_v3 }
   0x8   :  { %130 = vmatpush.msra.mxu2 %v35_v4  ;;  %131 = vmatpush.msra.mxu3 %v35_v4  ;;  %v23_v13 = vld [vmem:[#allocation2] sm:$0xff] }
   0x9   :  { %63 = vmatpush.msra.mxu0 %v35_v4  ;;  %129 = vmatpush.msra.mxu1 %v35_v4  ;;  %v24_v14 = vld [vmem:[#allocation2 + $0x8] sm:$0xff] }
   0xa   :  { %133 = vmatpush.msra.mxu2 %v34_v5  ;;  %134 = vmatpush.msra.mxu3 %v34_v5  ;;  %v25_v19 = vld [vmem:[#allocation2 + $0x10] sm:$0xff] }
   0xb   :  { %64 = vmatpush.msra.mxu0 %v34_v5  ;;  %132 = vmatpush.msra.mxu1 %v34_v5  ;;  %v26_v20 = vld [vmem:[#allocation2 + $0x18] sm:$0xff] }
   0xc   :  { %136 = vmatpush.msra.mxu2 %v33_v6  ;;  %137 = vmatpush.msra.mxu3 %v33_v6 }
   0xd   :  { %65 = vmatpush.msra.mxu0 %v33_v6  ;;  %135 = vmatpush.msra.mxu1 %v33_v6 }
   0xe   :  { %139 = vmatpush.msra.mxu2 %v32_v7  ;;  %140 = vmatpush.msra.mxu3 %v32_v7 }
   0xf   :  { %66 = vmatpush.msra.mxu0 %v32_v7  ;;  %138 = vmatpush.msra.mxu1 %v32_v7 }
  0x10   :  { %142 = vmatpush.msra.mxu2 %v31_v8  ;;  %143 = vmatpush.msra.mxu3 %v31_v8 }
  0x11   :  { %118 = vmatmul.msk.f32.vlgmr.msra.gmra.mxu2 %vm18_vm0, %v29_v9  ;;  %119 = vmatmul.msk.f32.vlgmr.msra.gmra.mxu3 %vm18_vm0, %v30_v10 }
  0x12   :  { %67 = vmatpush.msra.mxu0 %v31_v8  ;;  %141 = vmatpush.msra.mxu1 %v31_v8 }
  0x13   :  { %116 = vmatmul.msk.f32.vlgmr.msra.gmra.mxu0 %vm18_vm0, %v27_v11  ;;  %117 = vmatmul.msk.f32.vlgmr.msra.gmra.mxu1 %vm18_vm0, %v28_v12 }
  0x90   :  { %v69_v15 = vpop.f32.mrf.mxu0  ;;  %v72_v16 = vpop.f32.mrf.mxu1 }
  0x91   :  { %v81_v17 = vadd.f32 %v69_v15, %v23_v13  ;;  %v82_v18 = vadd.f32 %v72_v16, %v24_v14 }
  0x93   :  { %85 = vst.msk [vmem:[#allocation2] sm:$0xff] %vm18_vm0, %v81_v17 }
  0x94   :  { %86 = vst.msk [vmem:[#allocation2 + $0x8] sm:$0xff] %vm18_vm0, %v82_v18  ;;  %v75_v21 = vpop.f32.mrf.mxu2  ;;  %v78_v22 = vpop.f32.mrf.mxu3 }
  0x95   :  { %v83_v23 = vadd.f32 %v75_v21, %v25_v19  ;;  %v84_v24 = vadd.f32 %v78_v22, %v26_v20 }
  0x97   :  { %87 = vst.msk [vmem:[#allocation2 + $0x10] sm:$0xff] %vm18_vm0, %v83_v23 }
  0x98   :  { %88 = vst.msk [vmem:[#allocation2 + $0x18] sm:$0xff] %vm18_vm0, %v84_v24 }
  0x9a   :  { %v92_v26 = vld [vmem:[#allocation2] sm:$0xff] }
  0x9b   :  { %v100_v27 = vadd.f32 %v145_v25, %v92_v26  ;;  %v93_v28 = vld [vmem:[#allocation2 + $0x8] sm:$0xff] }
  0x9c   :  { %v101_v29 = vadd.f32 %v145_v25, %v93_v28 }
  0x9d   :  { %146 = vtanh.f32 %v100_v27 }
  0x9e   :  { %148 = vtanh.f32 %v101_v29  ;;  %v94_v30 = vld [vmem:[#allocation2 + $0x10] sm:$0xff] }
  0x9f   :  { %v102_v31 = vadd.f32 %v145_v25, %v94_v30  ;;  %v95_v32 = vld [vmem:[#allocation2 + $0x18] sm:$0xff] }
  0xa0   :  { %v103_v33 = vadd.f32 %v145_v25, %v95_v32 }
  0xa1   :  { %150 = vtanh.f32 %v102_v31 }
  0xa2   :  { %152 = vtanh.f32 %v103_v33 }
  0xa3   :  { %v147_v34 = vpop.eup %146 }
  0xa4   :  { %v149_v35 = vpop.eup %148  ;;  %108 = vst.msk [vmem:[%s245_s3] sm:$0xff] %vm18_vm0, %v147_v34 }
  0xa5   :  { %109 = vst.msk [vmem:[%s245_s3 + $0x8] sm:$0xff] %vm18_vm0, %v149_v35 }
  0xa7   :  { %v151_v36 = vpop.eup %150 }
  0xa8   :  { %v153_v37 = vpop.eup %152  ;;  %110 = vst.msk [vmem:[%s245_s3 + $0x10] sm:$0xff] %vm18_vm0, %v151_v36 }
  0xa9   :  { %111 = vst.msk [vmem:[%s245_s3 + $0x18] sm:$0xff] %vm18_vm0, %v153_v37 }

// kernel: vit22bgan_forward.18
= control target key start
LH: loop header
LB: loop body
LE: loop exit
PB: predicated region body
PF: predicated region fallthrough
CT: control target
= control target key end

     0   :  { %vm18_vm0 = vcmask 261120   ;;  %v126_v2 = vmov 0.0   ;;  %s202_s1 = inlined_call_operand.vmem [shape: f32[32,32], index: 1, kind: input, shape index: {}]   ;;  %s203_s2 = inlined_call_operand.vmem [shape: f32[1,32], index: 2, kind: input, shape index: {}]   ;;  %s204_s0 = inlined_call_operand.vmem [shape: f32[32,32], index: 0, kind: input, shape index: {}]   ;;  %s205_s3 = inlined_call_operand.vmem [shape: f32[32,32], index: 3, kind: output, shape index: {}]  }
   0x1   :  { %v34_v0 = vld [vmem:[%s202_s1 + $0x18] sm:$0xff]  ;;  %v33_v1 = vld [vmem:[%s202_s1 + $0x10] sm:$0xff]  ;;  %19 = vst.msk [vmem:[#allocation2] sm:$0xff] %vm18_vm0, %v126_v2  ;;  %v32_v3 = vld [vmem:[%s202_s1 + $0x8] sm:$0xff] }
   0x2   :  { %113 = vmatpush.msra.mxu2 %v34_v0  ;;  %114 = vmatpush.msra.mxu3 %v34_v0  ;;  %20 = vst.msk [vmem:[#allocation2 + $0x8] sm:$0xff] %vm18_vm0, %v126_v2  ;;  %v31_v4 = vld [vmem:[%s202_s1] sm:$0xff]  ;;  %v29_v5 = vld [vmem:[%s204_s0 + $0x10] sm:$0xff]  ;;  %v30_v6 = vld [vmem:[%s204_s0 + $0x18] sm:$0xff] }
   0x3   :  { %60 = vmatpush.msra.mxu0 %v34_v0  ;;  %112 = vmatpush.msra.mxu1 %v34_v0  ;;  %21 = vst.msk [vmem:[#allocation2 + $0x10] sm:$0xff] %vm18_vm0, %v126_v2  ;;  %v27_v7 = vld [vmem:[%s204_s0] sm:$0xff]  ;;  %v28_v8 = vld [vmem:[%s204_s0 + $0x8] sm:$0xff] }
   0x4   :  { %116 = vmatpush.msra.mxu2 %v33_v1  ;;  %117 = vmatpush.msra.mxu3 %v33_v1  ;;  %22 = vst.msk [vmem:[#allocation2 + $0x18] sm:$0xff] %vm18_vm0, %v126_v2  ;;  %v125_v21 = vld [vmem:[%s203_s2] ss:$0 sm:$0xff] }
   0x5   :  { %61 = vmatpush.msra.mxu0 %v33_v1  ;;  %115 = vmatpush.msra.mxu1 %v33_v1 }
   0x6   :  { %119 = vmatpush.msra.mxu2 %v32_v3  ;;  %120 = vmatpush.msra.mxu3 %v32_v3 }
   0x7   :  { %62 = vmatpush.msra.mxu0 %v32_v3  ;;  %118 = vmatpush.msra.mxu1 %v32_v3 }
   0x8   :  { %122 = vmatpush.msra.mxu2 %v31_v4  ;;  %123 = vmatpush.msra.mxu3 %v31_v4  ;;  %v23_v9 = vld [vmem:[#allocation2] sm:$0xff] }
   0x9   :  { %110 = vmatmul.msk.f32.vlgmr.msra.gmra.mxu2 %vm18_vm0, %v29_v5  ;;  %111 = vmatmul.msk.f32.vlgmr.msra.gmra.mxu3 %vm18_vm0, %v30_v6  ;;  %v24_v10 = vld [vmem:[#allocation2 + $0x8] sm:$0xff] }
   0xa   :  { %63 = vmatpush.msra.mxu0 %v31_v4  ;;  %121 = vmatpush.msra.mxu1 %v31_v4  ;;  %v25_v15 = vld [vmem:[#allocation2 + $0x10] sm:$0xff] }
   0xb   :  { %108 = vmatmul.msk.f32.vlgmr.msra.gmra.mxu0 %vm18_vm0, %v27_v7  ;;  %109 = vmatmul.msk.f32.vlgmr.msra.gmra.mxu1 %vm18_vm0, %v28_v8  ;;  %v26_v16 = vld [vmem:[#allocation2 + $0x18] sm:$0xff] }
  0x88   :  { %v65_v11 = vpop.f32.mrf.mxu0  ;;  %v68_v12 = vpop.f32.mrf.mxu1 }
  0x89   :  { %v77_v13 = vadd.f32 %v65_v11, %v23_v9  ;;  %v78_v14 = vadd.f32 %v68_v12, %v24_v10 }
  0x8b   :  { %81 = vst.msk [vmem:[#allocation2] sm:$0xff] %vm18_vm0, %v77_v13 }
  0x8c   :  { %82 = vst.msk [vmem:[#allocation2 + $0x8] sm:$0xff] %vm18_vm0, %v78_v14  ;;  %v71_v17 = vpop.f32.mrf.mxu2  ;;  %v74_v18 = vpop.f32.mrf.mxu3 }
  0x8d   :  { %v79_v19 = vadd.f32 %v71_v17, %v25_v15  ;;  %v80_v20 = vadd.f32 %v74_v18, %v26_v16 }
  0x8f   :  { %83 = vst.msk [vmem:[#allocation2 + $0x10] sm:$0xff] %vm18_vm0, %v79_v19 }
  0x90   :  { %84 = vst.msk [vmem:[#allocation2 + $0x18] sm:$0xff] %vm18_vm0, %v80_v20 }
  0x92   :  { %v88_v22 = vld [vmem:[#allocation2] sm:$0xff] }
  0x93   :  { %v96_v23 = vadd.f32 %v125_v21, %v88_v22  ;;  %v89_v24 = vld [vmem:[#allocation2 + $0x8] sm:$0xff] }
  0x94   :  { %v97_v25 = vadd.f32 %v125_v21, %v89_v24 }
  0x95   :  { %100 = vst.msk [vmem:[%s205_s3] sm:$0xff] %vm18_vm0, %v96_v23 }
  0x96   :  { %101 = vst.msk [vmem:[%s205_s3 + $0x8] sm:$0xff] %vm18_vm0, %v97_v25  ;;  %v90_v26 = vld [vmem:[#allocation2 + $0x10] sm:$0xff] }
  0x97   :  { %v98_v27 = vadd.f32 %v125_v21, %v90_v26  ;;  %v91_v28 = vld [vmem:[#allocation2 + $0x18] sm:$0xff] }
  0x98   :  { %v99_v29 = vadd.f32 %v125_v21, %v91_v28 }
  0x99   :  { %102 = vst.msk [vmem:[%s205_s3 + $0x10] sm:$0xff] %vm18_vm0, %v98_v27 }
  0x9a   :  { %103 = vst.msk [vmem:[%s205_s3 + $0x18] sm:$0xff] %vm18_vm0, %v99_v29 }

// kernel: vit22bgan_forward.19
= control target key start
LH: loop header
LB: loop body
LE: loop exit
PB: predicated region body
PF: predicated region fallthrough
CT: control target
= control target key end

     0   :  { %vm18_vm0 = vcmask 523264   ;;  %v315_v2 = vmov 0.0   ;;  %vm35_vm1 = vcmask 261120   ;;  %s467_s1 = inlined_call_operand.vmem [shape: f32[32,64], index: 1, kind: input, shape index: {}]   ;;  %s468_s2 = inlined_call_operand.vmem [shape: f32[1,64], index: 2, kind: input, shape index: {}]   ;;  %s469_s0 = inlined_call_operand.vmem [shape: f32[32,32], index: 0, kind: input, shape index: {}]   ;;  %s470_s3 = inlined_call_operand.vmem [shape: f32[32,64], index: 3, kind: output, shape index: {}]  }
   0x1   :  { %v34_v0 = vld [vmem:[%s467_s1 + $0x18] sm:$0xff]  ;;  %v33_v1 = vld [vmem:[%s467_s1 + $0x10] sm:$0xff]  ;;  %19 = vst.msk [vmem:[#allocation2] sm:$0xff] %vm18_vm0, %v315_v2  ;;  %v32_v3 = vld [vmem:[%s467_s1 + $0x8] sm:$0xff] }
   0x2   :  { %60 = vmatpush.msra.mxu0 %v34_v0  ;;  %293 = vmatpush.msra.mxu1 %v34_v0  ;;  %20 = vst.msk [vmem:[#allocation2 + $0x8] sm:$0xff] %vm18_vm0, %v315_v2  ;;  %v31_v4 = vld [vmem:[%s467_s1] sm:$0xff]  ;;  %v28_v6 = vld [vmem:[%s469_s0 + $0x8] sm:$0xff]  ;;  %v29_v7 = vld [vmem:[%s469_s0 + $0x10] sm:$0xff] }
   0x3   :  { %294 = vmatpush.msra.mxu2 %v34_v0  ;;  %295 = vmatpush.msra.mxu3 %v34_v0  ;;  %21 = vst.msk [vmem:[#allocation2 + $0x10] sm:$0xff] %vm18_vm0, %v315_v2  ;;  %v27_v5 = vld [vmem:[%s469_s0] sm:$0xff]  ;;  %v30_v8 = vld [vmem:[%s469_s0 + $0x18] sm:$0xff] }
   0x4   :  { %61 = vmatpush.msra.mxu0 %v33_v1  ;;  %296 = vmatpush.msra.mxu1 %v33_v1  ;;  %22 = vst.msk [vmem:[#allocation2 + $0x18] sm:$0xff] %vm18_vm0, %v315_v2  ;;  %v306_v17 = vld [vmem:[%s468_s2] ss:$0 sm:$0xff] }
   0x5   :  { %297 = vmatpush.msra.mxu2 %v33_v1  ;;  %298 = vmatpush.msra.mxu3 %v33_v1 }
   0x6   :  { %62 = vmatpush.msra.mxu0 %v32_v3  ;;  %299 = vmatpush.msra.mxu1 %v32_v3 }
   0x7   :  { %300 = vmatpush.msra.mxu2 %v32_v3  ;;  %301 = vmatpush.msra.mxu3 %v32_v3 }
   0x8   :  { %63 = vmatpush.msra.mxu0 %v31_v4  ;;  %302 = vmatpush.msra.mxu1 %v31_v4  ;;  %v23_v9 = vld [vmem:[#allocation2] sm:$0xff] }
   0x9   :  { %303 = vmatpush.msra.mxu2 %v31_v4  ;;  %304 = vmatpush.msra.mxu3 %v31_v4  ;;  %v24_v10 = vld [vmem:[#allocation2 + $0x8] sm:$0xff] }
   0xa   :  { %285 = vmatmul.msk.f32.vlgmr.msra.gmra.mxu0 %vm35_vm1, %v27_v5  ;;  %286 = vmatmul.msk.f32.vlgmr.msra.gmra.mxu1 %vm35_vm1, %v28_v6  ;;  %v25_v15 = vld [vmem:[#allocation2 + $0x10] sm:$0xff] }
   0xb   :  { %287 = vmatmul.msk.f32.vlgmr.msra.gmra.mxu2 %vm35_vm1, %v29_v7  ;;  %288 = vmatmul.msk.f32.vlgmr.msra.gmra.mxu3 %vm35_vm1, %v30_v8  ;;  %v26_v16 = vld [vmem:[#allocation2 + $0x18] sm:$0xff] }
  0x87   :  { %v65_v11 = vpop.f32.mrf.mxu0  ;;  %v68_v12 = vpop.f32.mrf.mxu1 }
  0x88   :  { %v77_v13 = vadd.f32 %v65_v11, %v23_v9  ;;  %v78_v14 = vadd.f32 %v68_v12, %v24_v10 }
  0x8a   :  { %82 = vst.msk [vmem:[#allocation2] sm:$0xff] %vm18_vm0, %v77_v13 }
  0x8b   :  { %83 = vst.msk [vmem:[#allocation2 + $0x8] sm:$0xff] %vm18_vm0, %v78_v14 }
  0x8e   :  { %v71_v18 = vpop.f32.mrf.mxu2  ;;  %v74_v19 = vpop.f32.mrf.mxu3 }
  0x8f   :  { %v79_v20 = vadd.f32 %v71_v18, %v25_v15  ;;  %v80_v21 = vadd.f32 %v74_v19, %v26_v16 }
  0x91   :  { %v89_v22 = vld [vmem:[#allocation2] sm:$0xff]  ;;  %84 = vst.msk [vmem:[#allocation2 + $0x10] sm:$0xff] %vm18_vm0, %v79_v20 }
  0x92   :  { %v370_v23 = vadd.f32 %v306_v17, %v89_v22  ;;  %v90_v24 = vld [vmem:[#allocation2 + $0x8] sm:$0xff]  ;;  %85 = vst.msk [vmem:[#allocation2 + $0x18] sm:$0xff] %vm18_vm0, %v80_v21 }
  0x93   :  { %v373_v25 = vadd.f32 %v306_v17, %v90_v24 }
  0x94   :  { %v376_v26 = vmul.f32 0.70710677, %v370_v23 }
  0x95   :  { %v379_v27 = vmul.f32 0.70710677, %v373_v25 }
  0x96   :  { %v109_v28 = vmul.f32 %v376_v26, %v376_v26 }
  0x97   :  { %v149_v29 = vmul.f32 %v379_v27, %v379_v27 }
  0x98   :  { %v110_v30 = vmin.f32 %v109_v28, 16.0  ;;  %v91_v31 = vld [vmem:[#allocation2 + $0x10] sm:$0xff] }
  0x99   :  { %v385_v32 = vmin.f32 %v149_v29, 16.0  ;;  %v387_v33 = vadd.f32 %v306_v17, %v91_v31  ;;  %v92_v34 = vld [vmem:[#allocation2 + $0x18] sm:$0xff] }
  0x9a   :  { %v111_v35 = vmul.f32 2.1237322e-06, %v110_v30  ;;  %v122_v36 = vmul.f32 3.8918573e-05, %v110_v30  ;;  %v389_v37 = vadd.f32 %v306_v17, %v92_v34 }
  0x9b   :  { %v151_v38 = vmul.f32 2.1237322e-06, %v385_v32  ;;  %v162_v39 = vmul.f32 3.8918573e-05, %v385_v32  ;;  %v394_v42 = vmul.f32 0.70710677, %v387_v33 }
  0x9c   :  { %v112_v40 = vadd.f32 0.00028619796, %v111_v35  ;;  %v123_v41 = vadd.f32 0.001143296, %v122_v36  ;;  %v399_v48 = vmul.f32 0.70710677, %v389_v37 }
  0x9d   :  { %v152_v43 = vadd.f32 0.00028619796, %v151_v38  ;;  %v163_v44 = vadd.f32 0.001143296, %v162_v39  ;;  %v189_v47 = vmul.f32 %v394_v42, %v394_v42 }
  0x9e   :  { %v113_v45 = vmul.f32 %v112_v40, %v110_v30  ;;  %v124_v46 = vmul.f32 %v123_v41, %v110_v30  ;;  %v229_v54 = vmul.f32 %v399_v48, %v399_v48 }
  0x9f   :  { %v153_v49 = vmul.f32 %v152_v43, %v385_v32  ;;  %v164_v50 = vmul.f32 %v163_v44, %v385_v32  ;;  %v403_v53 = vmin.f32 %v189_v47, 16.0 }
  0xa0   :  { %v114_v51 = vadd.f32 0.0036580483, %v113_v45  ;;  %v125_v52 = vadd.f32 0.014752088, %v124_v46  ;;  %v411_v63 = vmin.f32 %v229_v54, 16.0 }
  0xa1   :  { %v154_v55 = vadd.f32 0.0036580483, %v153_v49  ;;  %v165_v56 = vadd.f32 0.014752088, %v164_v50  ;;  %v191_v59 = vmul.f32 2.1237322e-06, %v403_v53 }
  0xa2   :  { %v115_v57 = vmul.f32 %v114_v51, %v110_v30  ;;  %v126_v58 = vmul.f32 %v125_v52, %v110_v30  ;;  %v202_v60 = vmul.f32 3.8918573e-05, %v403_v53  ;;  %v231_v11 = vmul.f32 2.1237322e-06, %v411_v63 }
  0xa3   :  { %v155_v61 = vmul.f32 %v154_v55, %v385_v32  ;;  %v166_v62 = vmul.f32 %v165_v56, %v385_v32  ;;  %v192_v2 = vadd.f32 0.00028619796, %v191_v59  ;;  %v242_v12 = vmul.f32 3.8918573e-05, %v411_v63 }
  0xa4   :  { %v116_v0 = vadd.f32 0.05243302, %v115_v57  ;;  %v127_v1 = vadd.f32 0.112945676, %v126_v58  ;;  %v203_v4 = vadd.f32 0.001143296, %v202_v60 }
  0xa5   :  { %v167_v3 = vadd.f32 0.112945676, %v166_v62  ;;  %v156_v7 = vadd.f32 0.05243302, %v155_v61  ;;  %v193_v8 = vmul.f32 %v192_v2, %v403_v53  ;;  %v232_v22 = vadd.f32 0.00028619796, %v231_v11 }
  0xa6   :  { %v117_v5 = vmul.f32 %v116_v0, %v110_v30  ;;  %v128_v6 = vmul.f32 %v127_v1, %v110_v30  ;;  %v204_v10 = vmul.f32 %v203_v4, %v403_v53  ;;  %v243_v24 = vadd.f32 0.001143296, %v242_v12 }
  0xa7   :  { %v168_v9 = vmul.f32 %v167_v3, %v385_v32  ;;  %v157_v18 = vmul.f32 %v156_v7, %v385_v32  ;;  %v194_v19 = vadd.f32 0.0036580483, %v193_v8  ;;  %v233_v39 = vmul.f32 %v232_v22, %v411_v63 }
  0xa8   :  { %v129_v13 = vadd.f32 0.4994258, %v128_v6  ;;  %v205_v15 = vadd.f32 0.014752088, %v204_v10  ;;  %v118_v16 = vadd.f32 0.18741608, %v117_v5  ;;  %v244_v34 = vmul.f32 %v243_v24, %v411_v63 }
  0xa9   :  { %v169_v14 = vadd.f32 0.4994258, %v168_v9  ;;  %v158_v36 = vadd.f32 0.18741608, %v157_v18  ;;  %v195_v38 = vmul.f32 %v194_v19, %v403_v53  ;;  %v234_v47 = vadd.f32 0.0036580483, %v233_v39 }
  0xaa   :  { %v130_v17 = vmul.f32 %v129_v13, %v110_v30  ;;  %v206_v21 = vmul.f32 %v205_v15, %v403_v53  ;;  %v119_v35 = vmul.f32 %v118_v16, %v110_v30  ;;  %v245_v41 = vadd.f32 0.014752088, %v244_v34 }
  0xab   :  { %v170_v20 = vmul.f32 %v169_v14, %v385_v32  ;;  %v159_v44 = vmul.f32 %v158_v36, %v385_v32  ;;  %v196_v45 = vadd.f32 0.05243302, %v195_v38  ;;  %v235_v32 = vmul.f32 %v234_v47, %v411_v63 }
  0xac   :  { %v131_v28 = vadd.f32 1.0, %v130_v17  ;;  %v207_v31 = vadd.f32 0.112945676, %v206_v21  ;;  %v120_v43 = vadd.f32 1.1283791, %v119_v35  ;;  %v246_v49 = vmul.f32 %v245_v41, %v411_v63 }
  0xad   :  { %v171_v29 = vadd.f32 1.0, %v170_v20  ;;  %v160_v55 = vadd.f32 1.1283791, %v159_v44  ;;  %v197_v59 = vmul.f32 %v196_v45, %v403_v53  ;;  %v236_v8 = vadd.f32 0.05243302, %v235_v32 }
  0xae   :  { %307 = vrcp.f32 %v131_v28  ;;  %v208_v40 = vmul.f32 %v207_v31, %v403_v53  ;;  %v121_v54 = vmul.f32 %v120_v43, %v376_v26  ;;  %v247_v57 = vadd.f32 0.112945676, %v246_v49 }
  0xaf   :  { %309 = vrcp.f32 %v171_v29  ;;  %v141_v61 = vand.u32 2147483647, %v131_v28  ;;  %v143_v62 = vand.u32 2147483648, %v131_v28  ;;  %v183_v3 = vand.u32 2147483648, %v171_v29 }
  0xb0   :  { %v209_v46 = vadd.f32 0.4994258, %v208_v40  ;;  %v248_v1 = vmul.f32 %v247_v57, %v411_v63  ;;  %v181_v4 = vand.u32 2147483647, %v171_v29  ;;  %vm137_vm4 = vweird.f32 %v131_v28 }
  0xb1   :  { %v198_v7 = vadd.f32 0.18741608, %v197_v59  ;;  %v144_v9 = vor.u32 1.1754944e-38, %v143_v62  ;;  %vm177_vm6 = vweird.f32 %v171_v29  ;;  %vm142_vm7 = vcmp.eq.f32.partialorder %v141_v61, 8.507059e+37 }
  0xb2   :  { %v210_v52 = vmul.f32 %v209_v46, %v403_v53  ;;  %v249_v5 = vadd.f32 0.4994258, %v248_v1  ;;  %v161_v13 = vmul.f32 %v160_v55, %v379_v27  ;;  %v184_v14 = vor.u32 1.1754944e-38, %v183_v3 }
  0xb3   :  { %vm182_vm9 = vcmp.eq.f32.partialorder %v181_v4, 8.507059e+37  ;;  %v199_v21 = vmul.f32 %v198_v7, %v403_v53  ;;  %v237_v22 = vmul.f32 %v236_v8, %v411_v63  ;;  %v101_v27 = vmul.f32 0.5, %v370_v23 }
  0xb4   :  { %v308_v50 = vpop.eup %307  ;;  %v430_v60 = vadd.f32 1.0, %v210_v52  ;;  %v250_v11 = vmul.f32 %v249_v5, %v411_v63  ;;  %v102_v31 = vmul.f32 0.5, %v373_v25 }
  0xb5   :  { %v310_v30 = vpop.eup %309  ;;  %v133_v51 = vmul.f32 %v308_v50, %v131_v28  ;;  %vm138_vm2 = vweird.f32 %v308_v50  ;;  %v200_v38 = vadd.f32 1.1283791, %v199_v21  ;;  %v238_v40 = vadd.f32 0.18741608, %v237_v22 }
  0xb6   :  { %v173_v56 = vmul.f32 %v310_v30, %v171_v29  ;;  %311 = vrcp.f32 %v430_v60  ;;  %vm178_vm3 = vweird.f32 %v310_v30  ;;  %vm139_vm5 = vmor %vm137_vm4, %vm138_vm2  ;;  %v251_v17 = vadd.f32 1.0, %v250_v11 }
  0xb7   :  { %v134_v58 = vsub.f32 1.0, %v133_v51  ;;  %vm179_vm8 = vmor %vm177_vm6, %vm178_vm3  ;;  %v223_v39 = vand.u32 2147483648, %v430_v60  ;;  %v221_v43 = vand.u32 2147483647, %v430_v60  ;;  %vm217_vm11 = vweird.f32 %v430_v60 }
  0xb8   :  { %v174_v0 = vsub.f32 1.0, %v173_v56  ;;  %313 = vrcp.f32 %v251_v17  ;;  %v239_v47 = vmul.f32 %v238_v40, %v411_v63  ;;  %v201_v49 = vmul.f32 %v200_v38, %v394_v42 }
  0xb9   :  { %v135_v2 = vmul.f32 %v308_v50, %v134_v58  ;;  %v224_v25 = vor.u32 1.1754944e-38, %v223_v39  ;;  %vm222_vm13 = vcmp.eq.f32.partialorder %v221_v43, 8.507059e+37  ;;  %v263_v56 = vand.u32 2147483648, %v251_v17 }
  0xba   :  { %v175_v26 = vmul.f32 %v310_v30, %v174_v0  ;;  %v240_v55 = vadd.f32 1.1283791, %v239_v47  ;;  %v261_v59 = vand.u32 2147483647, %v251_v17  ;;  %v103_v63 = vmul.f32 0.5, %v387_v33 }
  0xbb   :  { %v136_v6 = vadd.f32 %v308_v50, %v135_v2  ;;  %vm257_vm15 = vweird.f32 %v251_v17  ;;  %v264_v61 = vor.u32 1.1754944e-38, %v263_v56  ;;  %v104_v33 = vmul.f32 0.5, %v389_v37 }
  0xbc   :  { %v176_v10 = vadd.f32 %v310_v30, %v175_v26  ;;  %v312_v18 = vpop.eup %311  ;;  %v241_v62 = vmul.f32 %v240_v55, %v399_v48  ;;  %vm262_vm2 = vcmp.eq.f32.partialorder %v261_v59, 8.507059e+37 }
  0xbd   :  { %v140_v12 = vsel %vm139_vm5, %v308_v50, %v136_v6  ;;  %v213_v28 = vmul.f32 %v312_v18, %v430_v60  ;;  %vm218_vm10 = vweird.f32 %v312_v18 }
  0xbe   :  { %v145_v15 = vsel %vm142_vm7, %v144_v9, %v140_v12  ;;  %v180_v16 = vsel %vm179_vm8, %v310_v30, %v176_v10  ;;  %v314_v23 = vpop.eup %313  ;;  %vm219_vm12 = vmor %vm217_vm11, %vm218_vm10 }
  0xbf   :  { %v146_v19 = vmul.f32 %v145_v15, %v121_v54  ;;  %v185_v20 = vsel %vm182_vm9, %v184_v14, %v180_v16  ;;  %v214_v35 = vsub.f32 1.0, %v213_v28  ;;  %v253_v30 = vmul.f32 %v314_v23, %v251_v17 }
  0xc0   :  { %v186_v24 = vmul.f32 %v185_v20, %v161_v13  ;;  %vm258_vm14 = vweird.f32 %v314_v23 }
  0xc1   :  { %v289_v29 = vclamps-f32 %v146_v19, 1.0  ;;  %v215_v53 = vmul.f32 %v312_v18, %v214_v35  ;;  %v254_v54 = vsub.f32 1.0, %v253_v30  ;;  %vm259_vm1 = vmor %vm257_vm15, %vm258_vm14 }
  0xc2   :  { %v290_v34 = vclamps-f32 %v186_v24, 1.0 }
  0xc3   :  { %v269_v36 = vadd.f32 1.0, %v289_v29  ;;  %v216_v46 = vadd.f32 %v312_v18, %v215_v53  ;;  %v255_v58 = vmul.f32 %v314_v23, %v254_v54 }
  0xc4   :  { %v270_v41 = vadd.f32 1.0, %v290_v34 }
  0xc5   :  { %v273_v44 = vmul.f32 %v269_v36, %v101_v27  ;;  %v220_v50 = vsel %vm219_vm12, %v312_v18, %v216_v46  ;;  %v256_v32 = vadd.f32 %v314_v23, %v255_v58 }
  0xc6   :  { %v274_v45 = vmul.f32 %v270_v41, %v102_v31  ;;  %v225_v51 = vsel %vm222_vm13, %v224_v25, %v220_v50 }
  0xc7   :  { %277 = vst.msk [vmem:[%s470_s3] sm:$0xff] %vm18_vm0, %v273_v44  ;;  %v226_v52 = vmul.f32 %v225_v51, %v201_v49  ;;  %v260_v0 = vsel %vm259_vm1, %v314_v23, %v256_v32 }
  0xc8   :  { %278 = vst.msk [vmem:[%s470_s3 + $0x8] sm:$0xff] %vm18_vm0, %v274_v45  ;;  %v265_v1 = vsel %vm262_vm2, %v264_v61, %v260_v0 }
  0xc9   :  { %v291_v57 = vclamps-f32 %v226_v52, 1.0  ;;  %v266_v2 = vmul.f32 %v265_v1, %v241_v62 }
  0xcb   :  { %v271_v60 = vadd.f32 1.0, %v291_v57  ;;  %v292_v3 = vclamps-f32 %v266_v2, 1.0 }
  0xcd   :  { %v275_v42 = vmul.f32 %v271_v60, %v103_v63  ;;  %v272_v26 = vadd.f32 1.0, %v292_v3 }
  0xcf   :  { %279 = vst.msk [vmem:[%s470_s3 + $0x10] sm:$0xff] %vm18_vm0, %v275_v42  ;;  %v276_v4 = vmul.f32 %v272_v26, %v104_v33 }
  0xd1   :  { %280 = vst.msk [vmem:[%s470_s3 + $0x18] sm:$0xff] %vm18_vm0, %v276_v4 }

</bundles_post_ra>
